<compile_context>
chip_gen: v6e
topology: v6e:2x2x1
jax: 0.10.0
libtpu: 0.0.40
codegen_flags: <defaults>
</compile_context>

<pallas_src>
import jax
import jax.numpy as jnp
from jax import lax
from jax.experimental import pallas as pl
from jax.experimental.pallas import tpu as pltpu


def _rnn_judge_kernel(xx_ref, cs_ref, w_in_ref, w_hh_ref, b_ref, out_ref,
                      gin_ref):
    """Fused bidirectional LSTM encoder + candidate dot products.

    xx_ref  : (T*Bp, 2D) bf16  time-major rows; columns [x_t | x_{T-1-t}]
    cs_ref  : (Bp, nC, D) f32  candidates (batch padded with zero rows)
    w_in_ref: (2D, 8D)  bf16   input->gates, gate-grouped cols [i|f|o|g]
    w_hh_ref: (2D, 8D)  bf16   hidden->gates, block-diagonal, same grouping
    b_ref   : (1, 8D)   f32    combined bias (b_ih + b_hh), both directions
    out_ref : (Bp, nC)  f32    candidate scores (products)
    gin_ref : (T*Bp, 8D) f32   scratch: hoisted input+bias gate contributions
    """
    Bp, nC, D = cs_ref.shape
    TB = xx_ref.shape[0]
    T = TB // Bp
    H = 2 * D  # fused (bidirectional) per-gate width

    # (1) Hoisted input projection: one big MXU matmul for all T steps, both
    #     directions and all four gates; bias broadcast exactly once.
    gin_ref[...] = (
        jnp.dot(xx_ref[...], w_in_ref[...], preferred_element_type=jnp.float32)
        + b_ref[...])

    w_hh = w_hh_ref[...]  # loop-invariant; loaded once

    # (2) Single recurrence for both directions: the carry is the concatenated
    #     [forward | backward] hidden/cell state; one block-diagonal matmul,
    #     one sigmoid and one tanh per step.
    def step(t, carry):
        h, c = carry                                              # (Bp, 2D) f32
        row = pl.multiple_of(t * Bp, Bp)                          # Bp % 8 == 0
        g_in = gin_ref[pl.ds(row, Bp), :]                         # aligned (Bp, 8D)
        # TODO(synk): bf16 re-cast of the carried hidden compounds rounding over
        #   long sequences relative to a true f32 LSTM; re-check at prod T, D.
        gates = g_in + jnp.dot(h.astype(jnp.bfloat16), w_hh,
                               preferred_element_type=jnp.float32)
        sig = jax.nn.sigmoid(gates[:, :3 * H])                    # [i | f | o]
        g_g = jnp.tanh(gates[:, 3 * H:])                          # [g]
        c_new = sig[:, H:2 * H] * c + sig[:, :H] * g_g
        h_new = sig[:, 2 * H:] * jnp.tanh(c_new)
        return h_new, c_new

    h0 = jnp.zeros((Bp, H), jnp.float32)
    c0 = jnp.zeros((Bp, H), jnp.float32)
    h_fin, _ = lax.fori_loop(0, T, step, (h0, c0), unroll=True)

    # (3) Sum of forward/backward final hidden states (== sum(h_n, dim=0)).
    h_sum = h_fin[:, :D] + h_fin[:, D:]                           # (Bp, D)

    # (4) products = <candidate, h_sum>: VPU broadcast-multiply + lane reduce
    #     (avoids the degenerate q=1 batched MXU matmul and its lane-sparse
    #     per-batch stores).
    out_ref[...] = jnp.sum(cs_ref[...] * h_sum[:, None, :], axis=-1)


def init_params(key, word_vec_dim):
    """PyTorch-style uniform(-1/sqrt(D), 1/sqrt(D)) init for a one-layer
    bidirectional LSTM (hidden == word_vec_dim), packed for the fused kernel."""
    D = word_vec_dim
    bound = 1.0 / float(D) ** 0.5
    keys = jax.random.split(key, 8)

    def u(k, shape):
        return jax.random.uniform(k, shape, jnp.float32, -bound, bound)

    raw = dict(
        w_ih_f=u(keys[0], (4 * D, D)), w_hh_f=u(keys[1], (4 * D, D)),
        b_ih_f=u(keys[2], (4 * D,)),   b_hh_f=u(keys[3], (4 * D,)),
        w_ih_b=u(keys[4], (4 * D, D)), w_hh_b=u(keys[5], (4 * D, D)),
        b_ih_b=u(keys[6], (4 * D,)),   b_hh_b=u(keys[7], (4 * D,)),
    )

    # Fused gate layout: column groups [i | f | o | g], each 2D wide, laid out
    # [forward D | backward D] inside each group, so the kernel can apply ONE
    # sigmoid over columns 0:6D and ONE tanh over 6D:8D.  Rows 0:D of the fused
    # weights act on the forward input / forward hidden, rows D:2D on the
    # time-reversed input / backward hidden.  PyTorch row-block order is
    # (i, f, g, o) -> source block for fused (i, f, o, g) is (0, 1, 3, 2).
    w_in = jnp.zeros((2 * D, 8 * D), jnp.float32)
    w_hh = jnp.zeros((2 * D, 8 * D), jnp.float32)
    bias = jnp.zeros((8 * D,), jnp.float32)
    per_dir = [(raw["w_ih_f"], raw["w_hh_f"], raw["b_ih_f"], raw["b_hh_f"]),
               (raw["w_ih_b"], raw["w_hh_b"], raw["b_ih_b"], raw["b_hh_b"])]
    src_of = (0, 1, 3, 2)   # fused gate index -> PyTorch gate block index
    for gi in range(4):
        blk = slice(src_of[gi] * D, (src_of[gi] + 1) * D)
        for d, (wi, wh, bi, bh) in enumerate(per_dir):
            col = gi * 2 * D + d * D
            rows = slice(d * D, (d + 1) * D)
            w_in = w_in.at[rows, col:col + D].set(wi[blk].T)
            w_hh = w_hh.at[rows, col:col + D].set(wh[blk].T)
            bias = bias.at[col:col + D].set(bi[blk] + bh[blk])

    return dict(
        w_in=w_in.astype(jnp.bfloat16),
        w_hh=w_hh.astype(jnp.bfloat16),
        bias=bias.reshape(1, 8 * D),
        raw=raw,   # unpacked PyTorch-layout weights (reference only)
    )


@jax.jit
def rnn_judge_forward(Ks, Cs, params):
    """Ks: (B, n_keys, D), Cs: (B, n_candidates, D) -> (B, n_candidates, 2)."""
    B, _, D = Ks.shape
    nC = Cs.shape[1]

    # Glue (same semantics as the PyTorch module): query = [Ks ; 0 ; Cs].
    sep = jnp.zeros((B, 1, D), Ks.dtype)
    query = jnp.concatenate([Ks, sep, Cs], axis=1)                 # (B, T, D)
    T = query.shape[1]

    # Pad the batch to a sublane multiple so every per-step gin slice inside the
    # kernel is an aligned full-tile read.  Padded rows have zero input and zero
    # candidates and are sliced away on the way out.
    Bp = max(8, ((B + 7) // 8) * 8)
    pad = Bp - B

    # Time-major rows with the time-reversed copy packed alongside so the fused
    # bidirectional cell reads one contiguous row slab per step and the whole
    # input projection is a single matmul inside the kernel.  All of this prep
    # fuses under the single jit wrapping this function.
    q_tm = jnp.transpose(query, (1, 0, 2))                         # (T, B, D)
    q_tm = jnp.pad(q_tm, ((0, 0), (0, pad), (0, 0)))               # (T, Bp, D)
    xx = jnp.concatenate([q_tm, q_tm[::-1]], axis=-1)              # (T, Bp, 2D)
    xx = xx.reshape(T * Bp, 2 * D).astype(jnp.bfloat16)
    cs_p = jnp.pad(Cs.astype(jnp.float32),
                   ((0, pad), (0, 0), (0, 0)))                     # (Bp, nC, D)

    vmem = pl.BlockSpec(memory_space=pltpu.MemorySpace.VMEM)
    prods_p = pl.pallas_call(
        _rnn_judge_kernel,
        out_shape=jax.ShapeDtypeStruct((Bp, nC), jnp.float32),
        in_specs=[vmem] * 5,
        out_specs=vmem,
        scratch_shapes=[pltpu.VMEM((T * Bp, 8 * D), jnp.float32)],
    )(xx, cs_p, params["w_in"], params["w_hh"], params["bias"])

    prods = prods_p[:B]                                            # (B, nC)
    # [products, -products] built in the fused wrapper (kernel writes products).
    return jnp.stack([prods, -prods], axis=-1)                     # (B, nC, 2)


def _reference_forward(Ks, Cs, raw):
    """Pure-JAX reference (standard two-loop bidirectional LSTM) using the
    unpacked weights; mirrors the kernel's bf16 matmul operands."""
    B, _, D = Ks.shape
    sep = jnp.zeros((B, 1, D), Ks.dtype)
    q = jnp.concatenate([Ks, sep, Cs], axis=1)
    x = jnp.transpose(q, (1, 0, 2))                                # (T, B, D)
    T = x.shape[0]

    def run(x_seq, w_ih, w_hh, b_ih, b_hh):
        h = jnp.zeros((B, D), jnp.float32)
        c = jnp.zeros((B, D), jnp.float32)
        wiT = w_ih.T.astype(jnp.bfloat16)
        whT = w_hh.T.astype(jnp.bfloat16)
        bb = (b_ih + b_hh)[None, :]
        for t in range(T):
            gates = (jnp.dot(x_seq[t].astype(jnp.bfloat16), wiT,
                             preferred_element_type=jnp.float32)
                     + jnp.dot(h.astype(jnp.bfloat16), whT,
                               preferred_element_type=jnp.float32) + bb)
            i = jax.nn.sigmoid(gates[:, 0 * D:1 * D])
            f = jax.nn.sigmoid(gates[:, 1 * D:2 * D])
            g = jnp.tanh(gates[:, 2 * D:3 * D])
            o = jax.nn.sigmoid(gates[:, 3 * D:4 * D])
            c = f * c + i * g
            h = o * jnp.tanh(c)
        return h

    h_f = run(x, raw["w_ih_f"], raw["w_hh_f"], raw["b_ih_f"], raw["b_hh_f"])
    h_b = run(x[::-1], raw["w_ih_b"], raw["w_hh_b"], raw["b_ih_b"], raw["b_hh_b"])
    h_sum = h_f + h_b
    prods = jnp.einsum('bnd,bd->bn', Cs.astype(jnp.float32), h_sum)
    return jnp.stack([prods, -prods], axis=-1)


if __name__ == "__main__":
    key = jax.random.PRNGKey(0)
    k_keys, k_cands, k_params = jax.random.split(key, 3)

    batch, n_keys, n_cands, word_vec_dim = 2, 8, 8, 32
    Ks = jax.random.normal(k_keys, (batch, n_keys, word_vec_dim), jnp.float32)
    Cs = jax.random.normal(k_cands, (batch, n_cands, word_vec_dim), jnp.float32)

    params = init_params(k_params, word_vec_dim)

    result = rnn_judge_forward(Ks, Cs, params)
    jax.block_until_ready(result)

    assert result.shape == (batch, n_cands, 2), result.shape
    # second channel is exactly the negation of the first (built in wrapper)
    assert bool(jnp.allclose(result[..., 1], -result[..., 0]))
    assert bool(jnp.all(jnp.isfinite(result)))
    # validate the fused/packed/padded kernel against the unpacked two-loop ref
    ref = _reference_forward(Ks, Cs, params["raw"])
    assert bool(jnp.allclose(result, ref, rtol=5e-2, atol=5e-2)), (
        float(jnp.max(jnp.abs(result - ref))))
    print("KERNEL_OK")
</pallas_src>

<mosaic_0001>
module attributes {stable_mosaic.version = 11 : i64} {
  func.func @_rnn_judge_kernel(%arg0: memref<136x64xbf16, #tpu.memory_space<vmem>>, %arg1: memref<8x8x32xf32, #tpu.memory_space<vmem>>, %arg2: memref<64x256xbf16, #tpu.memory_space<vmem>>, %arg3: memref<64x256xbf16, #tpu.memory_space<vmem>>, %arg4: memref<1x256xf32, #tpu.memory_space<vmem>>, %arg5: memref<8x8xf32, #tpu.memory_space<vmem>>, %arg6: memref<136x256xf32, #tpu.memory_space<vmem>>) attributes {dimension_semantics = [], scalar_prefetch = 0 : i64, scratch_operands = 1 : i64, tpu.core_type = #tpu.core_type<tc>} {
    %c0 = arith.constant 0 : index
    %c0_0 = arith.constant 0 : index
    %0 = vector.load %arg0[%c0, %c0_0] : memref<136x64xbf16, #tpu.memory_space<vmem>>, vector<136x64xbf16>
    %c0_1 = arith.constant 0 : index
    %c0_2 = arith.constant 0 : index
    %1 = vector.load %arg2[%c0_1, %c0_2] : memref<64x256xbf16, #tpu.memory_space<vmem>>, vector<64x256xbf16>
    %cst = arith.constant dense<0.000000e+00> : vector<136x256xf32>
    %2 = tpu.matmul %0, %1, %cst {dimension_numbers = #tpu.dot_dimension_numbers<[1], [0], [0], [1], [0, 0, 1, 1], [], []>} : vector<136x64xbf16>, vector<64x256xbf16>, vector<136x256xf32> -> vector<136x256xf32>
    %c0_3 = arith.constant 0 : index
    %c0_4 = arith.constant 0 : index
    %3 = vector.load %arg4[%c0_3, %c0_4] : memref<1x256xf32, #tpu.memory_space<vmem>>, vector<1x256xf32>
    %4 = vector.broadcast %3 : vector<1x256xf32> to vector<136x256xf32>
    %5 = arith.addf %2, %4 : vector<136x256xf32>
    %c0_5 = arith.constant 0 : index
    %c0_6 = arith.constant 0 : index
    %6 = vector.load %arg6[%c0_5, %c0_6] : memref<136x256xf32, #tpu.memory_space<vmem>>, vector<136x256xf32>
    tpu.vector_store %arg6[%c0_5, %c0_6], %5 {strides = array<i32>} : memref<136x256xf32, #tpu.memory_space<vmem>>, vector<136x256xf32>,
    %c0_7 = arith.constant 0 : index
    %c0_8 = arith.constant 0 : index
    %7 = vector.load %arg3[%c0_7, %c0_8] : memref<64x256xbf16, #tpu.memory_space<vmem>>, vector<64x256xbf16>
    %cst_9 = arith.constant 0.000000e+00 : f32
    %8 = vector.broadcast %cst_9 : f32 to vector<8x64xf32>
    %cst_10 = arith.constant 0.000000e+00 : f32
    %9 = vector.broadcast %cst_10 : f32 to vector<8x64xf32>
    %c0_i32 = arith.constant 0 : i32
    %c8_i32 = arith.constant 8 : i32
    %10 = arith.muli %c0_i32, %c8_i32 : i32
    %11 = tpu.assume_multiple %10, 8 : i32
    %12 = arith.index_cast %11 : i32 to index
    %c0_11 = arith.constant 0 : index
    %13 = vector.load %arg6[%12, %c0_11] : memref<136x256xf32, #tpu.memory_space<vmem>>, vector<8x256xf32>
    %14 = arith.truncf %8 : vector<8x64xf32> to vector<8x64xbf16>
    %cst_12 = arith.constant dense<0.000000e+00> : vector<8x256xf32>
    %15 = tpu.matmul %14, %7, %cst_12 {dimension_numbers = #tpu.dot_dimension_numbers<[1], [0], [0], [1], [0, 0, 1, 1], [], []>} : vector<8x64xbf16>, vector<64x256xbf16>, vector<8x256xf32> -> vector<8x256xf32>
    %16 = arith.addf %13, %15 : vector<8x256xf32>
    %17 = vector.extract_strided_slice %16 {offsets = [0, 0], sizes = [8, 192], strides = [1, 1]} : vector<8x256xf32> to vector<8x192xf32>
    %18 = arith.negf %17 : vector<8x192xf32>
    %19 = math.exp %18 : vector<8x192xf32>
    %cst_13 = arith.constant 1.000000e+00 : f32
    %20 = vector.broadcast %cst_13 : f32 to vector<8x192xf32>
    %21 = arith.addf %20, %19 : vector<8x192xf32>
    %22 = arith.divf %20, %21 : vector<8x192xf32>
    %23 = vector.extract_strided_slice %16 {offsets = [0, 192], sizes = [8, 64], strides = [1, 1]} : vector<8x256xf32> to vector<8x64xf32>
    %24 = math.tanh %23 : vector<8x64xf32>
    %25 = vector.extract_strided_slice %22 {offsets = [0, 64], sizes = [8, 64], strides = [1, 1]} : vector<8x192xf32> to vector<8x64xf32>
    %26 = arith.mulf %25, %9 : vector<8x64xf32>
    %27 = vector.extract_strided_slice %22 {offsets = [0, 0], sizes = [8, 64], strides = [1, 1]} : vector<8x192xf32> to vector<8x64xf32>
    %28 = arith.mulf %27, %24 : vector<8x64xf32>
    %29 = arith.addf %26, %28 : vector<8x64xf32>
    %30 = vector.extract_strided_slice %22 {offsets = [0, 128], sizes = [8, 64], strides = [1, 1]} : vector<8x192xf32> to vector<8x64xf32>
    %31 = math.tanh %29 : vector<8x64xf32>
    %32 = arith.mulf %30, %31 : vector<8x64xf32>
    %c1_i32 = arith.constant 1 : i32
    %c8_i32_14 = arith.constant 8 : i32
    %33 = arith.muli %c1_i32, %c8_i32_14 : i32
    %34 = tpu.assume_multiple %33, 8 : i32
    %35 = arith.index_cast %34 : i32 to index
    %c0_15 = arith.constant 0 : index
    %36 = vector.load %arg6[%35, %c0_15] : memref<136x256xf32, #tpu.memory_space<vmem>>, vector<8x256xf32>
    %37 = arith.truncf %32 : vector<8x64xf32> to vector<8x64xbf16>
    %cst_16 = arith.constant dense<0.000000e+00> : vector<8x256xf32>
    %38 = tpu.matmul %37, %7, %cst_16 {dimension_numbers = #tpu.dot_dimension_numbers<[1], [0], [0], [1], [0, 0, 1, 1], [], []>} : vector<8x64xbf16>, vector<64x256xbf16>, vector<8x256xf32> -> vector<8x256xf32>
    %39 = arith.addf %36, %38 : vector<8x256xf32>
    %40 = vector.extract_strided_slice %39 {offsets = [0, 0], sizes = [8, 192], strides = [1, 1]} : vector<8x256xf32> to vector<8x192xf32>
    %41 = arith.negf %40 : vector<8x192xf32>
    %42 = math.exp %41 : vector<8x192xf32>
    %cst_17 = arith.constant 1.000000e+00 : f32
    %43 = vector.broadcast %cst_17 : f32 to vector<8x192xf32>
    %44 = arith.addf %43, %42 : vector<8x192xf32>
    %45 = arith.divf %43, %44 : vector<8x192xf32>
    %46 = vector.extract_strided_slice %39 {offsets = [0, 192], sizes = [8, 64], strides = [1, 1]} : vector<8x256xf32> to vector<8x64xf32>
    %47 = math.tanh %46 : vector<8x64xf32>
    %48 = vector.extract_strided_slice %45 {offsets = [0, 64], sizes = [8, 64], strides = [1, 1]} : vector<8x192xf32> to vector<8x64xf32>
    %49 = arith.mulf %48, %29 : vector<8x64xf32>
    %50 = vector.extract_strided_slice %45 {offsets = [0, 0], sizes = [8, 64], strides = [1, 1]} : vector<8x192xf32> to vector<8x64xf32>
    %51 = arith.mulf %50, %47 : vector<8x64xf32>
    %52 = arith.addf %49, %51 : vector<8x64xf32>
    %53 = vector.extract_strided_slice %45 {offsets = [0, 128], sizes = [8, 64], strides = [1, 1]} : vector<8x192xf32> to vector<8x64xf32>
    %54 = math.tanh %52 : vector<8x64xf32>
    %55 = arith.mulf %53, %54 : vector<8x64xf32>
    %c2_i32 = arith.constant 2 : i32
    %c8_i32_18 = arith.constant 8 : i32
    %56 = arith.muli %c2_i32, %c8_i32_18 : i32
    %57 = tpu.assume_multiple %56, 8 : i32
    %58 = arith.index_cast %57 : i32 to index
    %c0_19 = arith.constant 0 : index
    %59 = vector.load %arg6[%58, %c0_19] : memref<136x256xf32, #tpu.memory_space<vmem>>, vector<8x256xf32>
    %60 = arith.truncf %55 : vector<8x64xf32> to vector<8x64xbf16>
    %cst_20 = arith.constant dense<0.000000e+00> : vector<8x256xf32>
    %61 = tpu.matmul %60, %7, %cst_20 {dimension_numbers = #tpu.dot_dimension_numbers<[1], [0], [0], [1], [0, 0, 1, 1], [], []>} : vector<8x64xbf16>, vector<64x256xbf16>, vector<8x256xf32> -> vector<8x256xf32>
    %62 = arith.addf %59, %61 : vector<8x256xf32>
    %63 = vector.extract_strided_slice %62 {offsets = [0, 0], sizes = [8, 192], strides = [1, 1]} : vector<8x256xf32> to vector<8x192xf32>
    %64 = arith.negf %63 : vector<8x192xf32>
    %65 = math.exp %64 : vector<8x192xf32>
    %cst_21 = arith.constant 1.000000e+00 : f32
    %66 = vector.broadcast %cst_21 : f32 to vector<8x192xf32>
    %67 = arith.addf %66, %65 : vector<8x192xf32>
    %68 = arith.divf %66, %67 : vector<8x192xf32>
    %69 = vector.extract_strided_slice %62 {offsets = [0, 192], sizes = [8, 64], strides = [1, 1]} : vector<8x256xf32> to vector<8x64xf32>
    %70 = math.tanh %69 : vector<8x64xf32>
    %71 = vector.extract_strided_slice %68 {offsets = [0, 64], sizes = [8, 64], strides = [1, 1]} : vector<8x192xf32> to vector<8x64xf32>
    %72 = arith.mulf %71, %52 : vector<8x64xf32>
    %73 = vector.extract_strided_slice %68 {offsets = [0, 0], sizes = [8, 64], strides = [1, 1]} : vector<8x192xf32> to vector<8x64xf32>
    %74 = arith.mulf %73, %70 : vector<8x64xf32>
    %75 = arith.addf %72, %74 : vector<8x64xf32>
    %76 = vector.extract_strided_slice %68 {offsets = [0, 128], sizes = [8, 64], strides = [1, 1]} : vector<8x192xf32> to vector<8x64xf32>
    %77 = math.tanh %75 : vector<8x64xf32>
    %78 = arith.mulf %76, %77 : vector<8x64xf32>
    %c3_i32 = arith.constant 3 : i32
    %c8_i32_22 = arith.constant 8 : i32
    %79 = arith.muli %c3_i32, %c8_i32_22 : i32
    %80 = tpu.assume_multiple %79, 8 : i32
    %81 = arith.index_cast %80 : i32 to index
    %c0_23 = arith.constant 0 : index
    %82 = vector.load %arg6[%81, %c0_23] : memref<136x256xf32, #tpu.memory_space<vmem>>, vector<8x256xf32>
    %83 = arith.truncf %78 : vector<8x64xf32> to vector<8x64xbf16>
    %cst_24 = arith.constant dense<0.000000e+00> : vector<8x256xf32>
    %84 = tpu.matmul %83, %7, %cst_24 {dimension_numbers = #tpu.dot_dimension_numbers<[1], [0], [0], [1], [0, 0, 1, 1], [], []>} : vector<8x64xbf16>, vector<64x256xbf16>, vector<8x256xf32> -> vector<8x256xf32>
    %85 = arith.addf %82, %84 : vector<8x256xf32>
    %86 = vector.extract_strided_slice %85 {offsets = [0, 0], sizes = [8, 192], strides = [1, 1]} : vector<8x256xf32> to vector<8x192xf32>
    %87 = arith.negf %86 : vector<8x192xf32>
    %88 = math.exp %87 : vector<8x192xf32>
    %cst_25 = arith.constant 1.000000e+00 : f32
    %89 = vector.broadcast %cst_25 : f32 to vector<8x192xf32>
    %90 = arith.addf %89, %88 : vector<8x192xf32>
    %91 = arith.divf %89, %90 : vector<8x192xf32>
    %92 = vector.extract_strided_slice %85 {offsets = [0, 192], sizes = [8, 64], strides = [1, 1]} : vector<8x256xf32> to vector<8x64xf32>
    %93 = math.tanh %92 : vector<8x64xf32>
    %94 = vector.extract_strided_slice %91 {offsets = [0, 64], sizes = [8, 64], strides = [1, 1]} : vector<8x192xf32> to vector<8x64xf32>
    %95 = arith.mulf %94, %75 : vector<8x64xf32>
    %96 = vector.extract_strided_slice %91 {offsets = [0, 0], sizes = [8, 64], strides = [1, 1]} : vector<8x192xf32> to vector<8x64xf32>
    %97 = arith.mulf %96, %93 : vector<8x64xf32>
    %98 = arith.addf %95, %97 : vector<8x64xf32>
    %99 = vector.extract_strided_slice %91 {offsets = [0, 128], sizes = [8, 64], strides = [1, 1]} : vector<8x192xf32> to vector<8x64xf32>
    %100 = math.tanh %98 : vector<8x64xf32>
    %101 = arith.mulf %99, %100 : vector<8x64xf32>
    %c4_i32 = arith.constant 4 : i32
    %c8_i32_26 = arith.constant 8 : i32
    %102 = arith.muli %c4_i32, %c8_i32_26 : i32
    %103 = tpu.assume_multiple %102, 8 : i32
    %104 = arith.index_cast %103 : i32 to index
    %c0_27 = arith.constant 0 : index
    %105 = vector.load %arg6[%104, %c0_27] : memref<136x256xf32, #tpu.memory_space<vmem>>, vector<8x256xf32>
    %106 = arith.truncf %101 : vector<8x64xf32> to vector<8x64xbf16>
    %cst_28 = arith.constant dense<0.000000e+00> : vector<8x256xf32>
    %107 = tpu.matmul %106, %7, %cst_28 {dimension_numbers = #tpu.dot_dimension_numbers<[1], [0], [0], [1], [0, 0, 1, 1], [], []>} : vector<8x64xbf16>, vector<64x256xbf16>, vector<8x256xf32> -> vector<8x256xf32>
    %108 = arith.addf %105, %107 : vector<8x256xf32>
    %109 = vector.extract_strided_slice %108 {offsets = [0, 0], sizes = [8, 192], strides = [1, 1]} : vector<8x256xf32> to vector<8x192xf32>
    %110 = arith.negf %109 : vector<8x192xf32>
    %111 = math.exp %110 : vector<8x192xf32>
    %cst_29 = arith.constant 1.000000e+00 : f32
    %112 = vector.broadcast %cst_29 : f32 to vector<8x192xf32>
    %113 = arith.addf %112, %111 : vector<8x192xf32>
    %114 = arith.divf %112, %113 : vector<8x192xf32>
    %115 = vector.extract_strided_slice %108 {offsets = [0, 192], sizes = [8, 64], strides = [1, 1]} : vector<8x256xf32> to vector<8x64xf32>
    %116 = math.tanh %115 : vector<8x64xf32>
    %117 = vector.extract_strided_slice %114 {offsets = [0, 64], sizes = [8, 64], strides = [1, 1]} : vector<8x192xf32> to vector<8x64xf32>
    %118 = arith.mulf %117, %98 : vector<8x64xf32>
    %119 = vector.extract_strided_slice %114 {offsets = [0, 0], sizes = [8, 64], strides = [1, 1]} : vector<8x192xf32> to vector<8x64xf32>
    %120 = arith.mulf %119, %116 : vector<8x64xf32>
    %121 = arith.addf %118, %120 : vector<8x64xf32>
    %122 = vector.extract_strided_slice %114 {offsets = [0, 128], sizes = [8, 64], strides = [1, 1]} : vector<8x192xf32> to vector<8x64xf32>
    %123 = math.tanh %121 : vector<8x64xf32>
    %124 = arith.mulf %122, %123 : vector<8x64xf32>
    %c5_i32 = arith.constant 5 : i32
    %c8_i32_30 = arith.constant 8 : i32
    %125 = arith.muli %c5_i32, %c8_i32_30 : i32
    %126 = tpu.assume_multiple %125, 8 : i32
    %127 = arith.index_cast %126 : i32 to index
    %c0_31 = arith.constant 0 : index
    %128 = vector.load %arg6[%127, %c0_31] : memref<136x256xf32, #tpu.memory_space<vmem>>, vector<8x256xf32>
    %129 = arith.truncf %124 : vector<8x64xf32> to vector<8x64xbf16>
    %cst_32 = arith.constant dense<0.000000e+00> : vector<8x256xf32>
    %130 = tpu.matmul %129, %7, %cst_32 {dimension_numbers = #tpu.dot_dimension_numbers<[1], [0], [0], [1], [0, 0, 1, 1], [], []>} : vector<8x64xbf16>, vector<64x256xbf16>, vector<8x256xf32> -> vector<8x256xf32>
    %131 = arith.addf %128, %130 : vector<8x256xf32>
    %132 = vector.extract_strided_slice %131 {offsets = [0, 0], sizes = [8, 192], strides = [1, 1]} : vector<8x256xf32> to vector<8x192xf32>
    %133 = arith.negf %132 : vector<8x192xf32>
    %134 = math.exp %133 : vector<8x192xf32>
    %cst_33 = arith.constant 1.000000e+00 : f32
    %135 = vector.broadcast %cst_33 : f32 to vector<8x192xf32>
    %136 = arith.addf %135, %134 : vector<8x192xf32>
    %137 = arith.divf %135, %136 : vector<8x192xf32>
    %138 = vector.extract_strided_slice %131 {offsets = [0, 192], sizes = [8, 64], strides = [1, 1]} : vector<8x256xf32> to vector<8x64xf32>
    %139 = math.tanh %138 : vector<8x64xf32>
    %140 = vector.extract_strided_slice %137 {offsets = [0, 64], sizes = [8, 64], strides = [1, 1]} : vector<8x192xf32> to vector<8x64xf32>
    %141 = arith.mulf %140, %121 : vector<8x64xf32>
    %142 = vector.extract_strided_slice %137 {offsets = [0, 0], sizes = [8, 64], strides = [1, 1]} : vector<8x192xf32> to vector<8x64xf32>
    %143 = arith.mulf %142, %139 : vector<8x64xf32>
    %144 = arith.addf %141, %143 : vector<8x64xf32>
    %145 = vector.extract_strided_slice %137 {offsets = [0, 128], sizes = [8, 64], strides = [1, 1]} : vector<8x192xf32> to vector<8x64xf32>
    %146 = math.tanh %144 : vector<8x64xf32>
    %147 = arith.mulf %145, %146 : vector<8x64xf32>
    %c6_i32 = arith.constant 6 : i32
    %c8_i32_34 = arith.constant 8 : i32
    %148 = arith.muli %c6_i32, %c8_i32_34 : i32
    %149 = tpu.assume_multiple %148, 8 : i32
    %150 = arith.index_cast %149 : i32 to index
    %c0_35 = arith.constant 0 : index
    %151 = vector.load %arg6[%150, %c0_35] : memref<136x256xf32, #tpu.memory_space<vmem>>, vector<8x256xf32>
    %152 = arith.truncf %147 : vector<8x64xf32> to vector<8x64xbf16>
    %cst_36 = arith.constant dense<0.000000e+00> : vector<8x256xf32>
    %153 = tpu.matmul %152, %7, %cst_36 {dimension_numbers = #tpu.dot_dimension_numbers<[1], [0], [0], [1], [0, 0, 1, 1], [], []>} : vector<8x64xbf16>, vector<64x256xbf16>, vector<8x256xf32> -> vector<8x256xf32>
    %154 = arith.addf %151, %153 : vector<8x256xf32>
    %155 = vector.extract_strided_slice %154 {offsets = [0, 0], sizes = [8, 192], strides = [1, 1]} : vector<8x256xf32> to vector<8x192xf32>
    %156 = arith.negf %155 : vector<8x192xf32>
    %157 = math.exp %156 : vector<8x192xf32>
    %cst_37 = arith.constant 1.000000e+00 : f32
    %158 = vector.broadcast %cst_37 : f32 to vector<8x192xf32>
    %159 = arith.addf %158, %157 : vector<8x192xf32>
    %160 = arith.divf %158, %159 : vector<8x192xf32>
    %161 = vector.extract_strided_slice %154 {offsets = [0, 192], sizes = [8, 64], strides = [1, 1]} : vector<8x256xf32> to vector<8x64xf32>
    %162 = math.tanh %161 : vector<8x64xf32>
    %163 = vector.extract_strided_slice %160 {offsets = [0, 64], sizes = [8, 64], strides = [1, 1]} : vector<8x192xf32> to vector<8x64xf32>
    %164 = arith.mulf %163, %144 : vector<8x64xf32>
    %165 = vector.extract_strided_slice %160 {offsets = [0, 0], sizes = [8, 64], strides = [1, 1]} : vector<8x192xf32> to vector<8x64xf32>
    %166 = arith.mulf %165, %162 : vector<8x64xf32>
    %167 = arith.addf %164, %166 : vector<8x64xf32>
    %168 = vector.extract_strided_slice %160 {offsets = [0, 128], sizes = [8, 64], strides = [1, 1]} : vector<8x192xf32> to vector<8x64xf32>
    %169 = math.tanh %167 : vector<8x64xf32>
    %170 = arith.mulf %168, %169 : vector<8x64xf32>
    %c7_i32 = arith.constant 7 : i32
    %c8_i32_38 = arith.constant 8 : i32
    %171 = arith.muli %c7_i32, %c8_i32_38 : i32
    %172 = tpu.assume_multiple %171, 8 : i32
    %173 = arith.index_cast %172 : i32 to index
    %c0_39 = arith.constant 0 : index
    %174 = vector.load %arg6[%173, %c0_39] : memref<136x256xf32, #tpu.memory_space<vmem>>, vector<8x256xf32>
    %175 = arith.truncf %170 : vector<8x64xf32> to vector<8x64xbf16>
    %cst_40 = arith.constant dense<0.000000e+00> : vector<8x256xf32>
    %176 = tpu.matmul %175, %7, %cst_40 {dimension_numbers = #tpu.dot_dimension_numbers<[1], [0], [0], [1], [0, 0, 1, 1], [], []>} : vector<8x64xbf16>, vector<64x256xbf16>, vector<8x256xf32> -> vector<8x256xf32>
    %177 = arith.addf %174, %176 : vector<8x256xf32>
    %178 = vector.extract_strided_slice %177 {offsets = [0, 0], sizes = [8, 192], strides = [1, 1]} : vector<8x256xf32> to vector<8x192xf32>
    %179 = arith.negf %178 : vector<8x192xf32>
    %180 = math.exp %179 : vector<8x192xf32>
    %cst_41 = arith.constant 1.000000e+00 : f32
    %181 = vector.broadcast %cst_41 : f32 to vector<8x192xf32>
    %182 = arith.addf %181, %180 : vector<8x192xf32>
    %183 = arith.divf %181, %182 : vector<8x192xf32>
    %184 = vector.extract_strided_slice %177 {offsets = [0, 192], sizes = [8, 64], strides = [1, 1]} : vector<8x256xf32> to vector<8x64xf32>
    %185 = math.tanh %184 : vector<8x64xf32>
    %186 = vector.extract_strided_slice %183 {offsets = [0, 64], sizes = [8, 64], strides = [1, 1]} : vector<8x192xf32> to vector<8x64xf32>
    %187 = arith.mulf %186, %167 : vector<8x64xf32>
    %188 = vector.extract_strided_slice %183 {offsets = [0, 0], sizes = [8, 64], strides = [1, 1]} : vector<8x192xf32> to vector<8x64xf32>
    %189 = arith.mulf %188, %185 : vector<8x64xf32>
    %190 = arith.addf %187, %189 : vector<8x64xf32>
    %191 = vector.extract_strided_slice %183 {offsets = [0, 128], sizes = [8, 64], strides = [1, 1]} : vector<8x192xf32> to vector<8x64xf32>
    %192 = math.tanh %190 : vector<8x64xf32>
    %193 = arith.mulf %191, %192 : vector<8x64xf32>
    %c8_i32_42 = arith.constant 8 : i32
    %c8_i32_43 = arith.constant 8 : i32
    %194 = arith.muli %c8_i32_42, %c8_i32_43 : i32
    %195 = tpu.assume_multiple %194, 8 : i32
    %196 = arith.index_cast %195 : i32 to index
    %c0_44 = arith.constant 0 : index
    %197 = vector.load %arg6[%196, %c0_44] : memref<136x256xf32, #tpu.memory_space<vmem>>, vector<8x256xf32>
    %198 = arith.truncf %193 : vector<8x64xf32> to vector<8x64xbf16>
    %cst_45 = arith.constant dense<0.000000e+00> : vector<8x256xf32>
    %199 = tpu.matmul %198, %7, %cst_45 {dimension_numbers = #tpu.dot_dimension_numbers<[1], [0], [0], [1], [0, 0, 1, 1], [], []>} : vector<8x64xbf16>, vector<64x256xbf16>, vector<8x256xf32> -> vector<8x256xf32>
    %200 = arith.addf %197, %199 : vector<8x256xf32>
    %201 = vector.extract_strided_slice %200 {offsets = [0, 0], sizes = [8, 192], strides = [1, 1]} : vector<8x256xf32> to vector<8x192xf32>
    %202 = arith.negf %201 : vector<8x192xf32>
    %203 = math.exp %202 : vector<8x192xf32>
    %cst_46 = arith.constant 1.000000e+00 : f32
    %204 = vector.broadcast %cst_46 : f32 to vector<8x192xf32>
    %205 = arith.addf %204, %203 : vector<8x192xf32>
    %206 = arith.divf %204, %205 : vector<8x192xf32>
    %207 = vector.extract_strided_slice %200 {offsets = [0, 192], sizes = [8, 64], strides = [1, 1]} : vector<8x256xf32> to vector<8x64xf32>
    %208 = math.tanh %207 : vector<8x64xf32>
    %209 = vector.extract_strided_slice %206 {offsets = [0, 64], sizes = [8, 64], strides = [1, 1]} : vector<8x192xf32> to vector<8x64xf32>
    %210 = arith.mulf %209, %190 : vector<8x64xf32>
    %211 = vector.extract_strided_slice %206 {offsets = [0, 0], sizes = [8, 64], strides = [1, 1]} : vector<8x192xf32> to vector<8x64xf32>
    %212 = arith.mulf %211, %208 : vector<8x64xf32>
    %213 = arith.addf %210, %212 : vector<8x64xf32>
    %214 = vector.extract_strided_slice %206 {offsets = [0, 128], sizes = [8, 64], strides = [1, 1]} : vector<8x192xf32> to vector<8x64xf32>
    %215 = math.tanh %213 : vector<8x64xf32>
    %216 = arith.mulf %214, %215 : vector<8x64xf32>
    %c9_i32 = arith.constant 9 : i32
    %c8_i32_47 = arith.constant 8 : i32
    %217 = arith.muli %c9_i32, %c8_i32_47 : i32
    %218 = tpu.assume_multiple %217, 8 : i32
    %219 = arith.index_cast %218 : i32 to index
    %c0_48 = arith.constant 0 : index
    %220 = vector.load %arg6[%219, %c0_48] : memref<136x256xf32, #tpu.memory_space<vmem>>, vector<8x256xf32>
    %221 = arith.truncf %216 : vector<8x64xf32> to vector<8x64xbf16>
    %cst_49 = arith.constant dense<0.000000e+00> : vector<8x256xf32>
    %222 = tpu.matmul %221, %7, %cst_49 {dimension_numbers = #tpu.dot_dimension_numbers<[1], [0], [0], [1], [0, 0, 1, 1], [], []>} : vector<8x64xbf16>, vector<64x256xbf16>, vector<8x256xf32> -> vector<8x256xf32>
    %223 = arith.addf %220, %222 : vector<8x256xf32>
    %224 = vector.extract_strided_slice %223 {offsets = [0, 0], sizes = [8, 192], strides = [1, 1]} : vector<8x256xf32> to vector<8x192xf32>
    %225 = arith.negf %224 : vector<8x192xf32>
    %226 = math.exp %225 : vector<8x192xf32>
    %cst_50 = arith.constant 1.000000e+00 : f32
    %227 = vector.broadcast %cst_50 : f32 to vector<8x192xf32>
    %228 = arith.addf %227, %226 : vector<8x192xf32>
    %229 = arith.divf %227, %228 : vector<8x192xf32>
    %230 = vector.extract_strided_slice %223 {offsets = [0, 192], sizes = [8, 64], strides = [1, 1]} : vector<8x256xf32> to vector<8x64xf32>
    %231 = math.tanh %230 : vector<8x64xf32>
    %232 = vector.extract_strided_slice %229 {offsets = [0, 64], sizes = [8, 64], strides = [1, 1]} : vector<8x192xf32> to vector<8x64xf32>
    %233 = arith.mulf %232, %213 : vector<8x64xf32>
    %234 = vector.extract_strided_slice %229 {offsets = [0, 0], sizes = [8, 64], strides = [1, 1]} : vector<8x192xf32> to vector<8x64xf32>
    %235 = arith.mulf %234, %231 : vector<8x64xf32>
    %236 = arith.addf %233, %235 : vector<8x64xf32>
    %237 = vector.extract_strided_slice %229 {offsets = [0, 128], sizes = [8, 64], strides = [1, 1]} : vector<8x192xf32> to vector<8x64xf32>
    %238 = math.tanh %236 : vector<8x64xf32>
    %239 = arith.mulf %237, %238 : vector<8x64xf32>
    %c10_i32 = arith.constant 10 : i32
    %c8_i32_51 = arith.constant 8 : i32
    %240 = arith.muli %c10_i32, %c8_i32_51 : i32
    %241 = tpu.assume_multiple %240, 8 : i32
    %242 = arith.index_cast %241 : i32 to index
    %c0_52 = arith.constant 0 : index
    %243 = vector.load %arg6[%242, %c0_52] : memref<136x256xf32, #tpu.memory_space<vmem>>, vector<8x256xf32>
    %244 = arith.truncf %239 : vector<8x64xf32> to vector<8x64xbf16>
    %cst_53 = arith.constant dense<0.000000e+00> : vector<8x256xf32>
    %245 = tpu.matmul %244, %7, %cst_53 {dimension_numbers = #tpu.dot_dimension_numbers<[1], [0], [0], [1], [0, 0, 1, 1], [], []>} : vector<8x64xbf16>, vector<64x256xbf16>, vector<8x256xf32> -> vector<8x256xf32>
    %246 = arith.addf %243, %245 : vector<8x256xf32>
    %247 = vector.extract_strided_slice %246 {offsets = [0, 0], sizes = [8, 192], strides = [1, 1]} : vector<8x256xf32> to vector<8x192xf32>
    %248 = arith.negf %247 : vector<8x192xf32>
    %249 = math.exp %248 : vector<8x192xf32>
    %cst_54 = arith.constant 1.000000e+00 : f32
    %250 = vector.broadcast %cst_54 : f32 to vector<8x192xf32>
    %251 = arith.addf %250, %249 : vector<8x192xf32>
    %252 = arith.divf %250, %251 : vector<8x192xf32>
    %253 = vector.extract_strided_slice %246 {offsets = [0, 192], sizes = [8, 64], strides = [1, 1]} : vector<8x256xf32> to vector<8x64xf32>
    %254 = math.tanh %253 : vector<8x64xf32>
    %255 = vector.extract_strided_slice %252 {offsets = [0, 64], sizes = [8, 64], strides = [1, 1]} : vector<8x192xf32> to vector<8x64xf32>
    %256 = arith.mulf %255, %236 : vector<8x64xf32>
    %257 = vector.extract_strided_slice %252 {offsets = [0, 0], sizes = [8, 64], strides = [1, 1]} : vector<8x192xf32> to vector<8x64xf32>
    %258 = arith.mulf %257, %254 : vector<8x64xf32>
    %259 = arith.addf %256, %258 : vector<8x64xf32>
    %260 = vector.extract_strided_slice %252 {offsets = [0, 128], sizes = [8, 64], strides = [1, 1]} : vector<8x192xf32> to vector<8x64xf32>
    %261 = math.tanh %259 : vector<8x64xf32>
    %262 = arith.mulf %260, %261 : vector<8x64xf32>
    %c11_i32 = arith.constant 11 : i32
    %c8_i32_55 = arith.constant 8 : i32
    %263 = arith.muli %c11_i32, %c8_i32_55 : i32
    %264 = tpu.assume_multiple %263, 8 : i32
    %265 = arith.index_cast %264 : i32 to index
    %c0_56 = arith.constant 0 : index
    %266 = vector.load %arg6[%265, %c0_56] : memref<136x256xf32, #tpu.memory_space<vmem>>, vector<8x256xf32>
    %267 = arith.truncf %262 : vector<8x64xf32> to vector<8x64xbf16>
    %cst_57 = arith.constant dense<0.000000e+00> : vector<8x256xf32>
    %268 = tpu.matmul %267, %7, %cst_57 {dimension_numbers = #tpu.dot_dimension_numbers<[1], [0], [0], [1], [0, 0, 1, 1], [], []>} : vector<8x64xbf16>, vector<64x256xbf16>, vector<8x256xf32> -> vector<8x256xf32>
    %269 = arith.addf %266, %268 : vector<8x256xf32>
    %270 = vector.extract_strided_slice %269 {offsets = [0, 0], sizes = [8, 192], strides = [1, 1]} : vector<8x256xf32> to vector<8x192xf32>
    %271 = arith.negf %270 : vector<8x192xf32>
    %272 = math.exp %271 : vector<8x192xf32>
    %cst_58 = arith.constant 1.000000e+00 : f32
    %273 = vector.broadcast %cst_58 : f32 to vector<8x192xf32>
    %274 = arith.addf %273, %272 : vector<8x192xf32>
    %275 = arith.divf %273, %274 : vector<8x192xf32>
    %276 = vector.extract_strided_slice %269 {offsets = [0, 192], sizes = [8, 64], strides = [1, 1]} : vector<8x256xf32> to vector<8x64xf32>
    %277 = math.tanh %276 : vector<8x64xf32>
    %278 = vector.extract_strided_slice %275 {offsets = [0, 64], sizes = [8, 64], strides = [1, 1]} : vector<8x192xf32> to vector<8x64xf32>
    %279 = arith.mulf %278, %259 : vector<8x64xf32>
    %280 = vector.extract_strided_slice %275 {offsets = [0, 0], sizes = [8, 64], strides = [1, 1]} : vector<8x192xf32> to vector<8x64xf32>
    %281 = arith.mulf %280, %277 : vector<8x64xf32>
    %282 = arith.addf %279, %281 : vector<8x64xf32>
    %283 = vector.extract_strided_slice %275 {offsets = [0, 128], sizes = [8, 64], strides = [1, 1]} : vector<8x192xf32> to vector<8x64xf32>
    %284 = math.tanh %282 : vector<8x64xf32>
    %285 = arith.mulf %283, %284 : vector<8x64xf32>
    %c12_i32 = arith.constant 12 : i32
    %c8_i32_59 = arith.constant 8 : i32
    %286 = arith.muli %c12_i32, %c8_i32_59 : i32
    %287 = tpu.assume_multiple %286, 8 : i32
    %288 = arith.index_cast %287 : i32 to index
    %c0_60 = arith.constant 0 : index
    %289 = vector.load %arg6[%288, %c0_60] : memref<136x256xf32, #tpu.memory_space<vmem>>, vector<8x256xf32>
    %290 = arith.truncf %285 : vector<8x64xf32> to vector<8x64xbf16>
    %cst_61 = arith.constant dense<0.000000e+00> : vector<8x256xf32>
    %291 = tpu.matmul %290, %7, %cst_61 {dimension_numbers = #tpu.dot_dimension_numbers<[1], [0], [0], [1], [0, 0, 1, 1], [], []>} : vector<8x64xbf16>, vector<64x256xbf16>, vector<8x256xf32> -> vector<8x256xf32>
    %292 = arith.addf %289, %291 : vector<8x256xf32>
    %293 = vector.extract_strided_slice %292 {offsets = [0, 0], sizes = [8, 192], strides = [1, 1]} : vector<8x256xf32> to vector<8x192xf32>
    %294 = arith.negf %293 : vector<8x192xf32>
    %295 = math.exp %294 : vector<8x192xf32>
    %cst_62 = arith.constant 1.000000e+00 : f32
    %296 = vector.broadcast %cst_62 : f32 to vector<8x192xf32>
    %297 = arith.addf %296, %295 : vector<8x192xf32>
    %298 = arith.divf %296, %297 : vector<8x192xf32>
    %299 = vector.extract_strided_slice %292 {offsets = [0, 192], sizes = [8, 64], strides = [1, 1]} : vector<8x256xf32> to vector<8x64xf32>
    %300 = math.tanh %299 : vector<8x64xf32>
    %301 = vector.extract_strided_slice %298 {offsets = [0, 64], sizes = [8, 64], strides = [1, 1]} : vector<8x192xf32> to vector<8x64xf32>
    %302 = arith.mulf %301, %282 : vector<8x64xf32>
    %303 = vector.extract_strided_slice %298 {offsets = [0, 0], sizes = [8, 64], strides = [1, 1]} : vector<8x192xf32> to vector<8x64xf32>
    %304 = arith.mulf %303, %300 : vector<8x64xf32>
    %305 = arith.addf %302, %304 : vector<8x64xf32>
    %306 = vector.extract_strided_slice %298 {offsets = [0, 128], sizes = [8, 64], strides = [1, 1]} : vector<8x192xf32> to vector<8x64xf32>
    %307 = math.tanh %305 : vector<8x64xf32>
    %308 = arith.mulf %306, %307 : vector<8x64xf32>
    %c13_i32 = arith.constant 13 : i32
    %c8_i32_63 = arith.constant 8 : i32
    %309 = arith.muli %c13_i32, %c8_i32_63 : i32
    %310 = tpu.assume_multiple %309, 8 : i32
    %311 = arith.index_cast %310 : i32 to index
    %c0_64 = arith.constant 0 : index
    %312 = vector.load %arg6[%311, %c0_64] : memref<136x256xf32, #tpu.memory_space<vmem>>, vector<8x256xf32>
    %313 = arith.truncf %308 : vector<8x64xf32> to vector<8x64xbf16>
    %cst_65 = arith.constant dense<0.000000e+00> : vector<8x256xf32>
    %314 = tpu.matmul %313, %7, %cst_65 {dimension_numbers = #tpu.dot_dimension_numbers<[1], [0], [0], [1], [0, 0, 1, 1], [], []>} : vector<8x64xbf16>, vector<64x256xbf16>, vector<8x256xf32> -> vector<8x256xf32>
    %315 = arith.addf %312, %314 : vector<8x256xf32>
    %316 = vector.extract_strided_slice %315 {offsets = [0, 0], sizes = [8, 192], strides = [1, 1]} : vector<8x256xf32> to vector<8x192xf32>
    %317 = arith.negf %316 : vector<8x192xf32>
    %318 = math.exp %317 : vector<8x192xf32>
    %cst_66 = arith.constant 1.000000e+00 : f32
    %319 = vector.broadcast %cst_66 : f32 to vector<8x192xf32>
    %320 = arith.addf %319, %318 : vector<8x192xf32>
    %321 = arith.divf %319, %320 : vector<8x192xf32>
    %322 = vector.extract_strided_slice %315 {offsets = [0, 192], sizes = [8, 64], strides = [1, 1]} : vector<8x256xf32> to vector<8x64xf32>
    %323 = math.tanh %322 : vector<8x64xf32>
    %324 = vector.extract_strided_slice %321 {offsets = [0, 64], sizes = [8, 64], strides = [1, 1]} : vector<8x192xf32> to vector<8x64xf32>
    %325 = arith.mulf %324, %305 : vector<8x64xf32>
    %326 = vector.extract_strided_slice %321 {offsets = [0, 0], sizes = [8, 64], strides = [1, 1]} : vector<8x192xf32> to vector<8x64xf32>
    %327 = arith.mulf %326, %323 : vector<8x64xf32>
    %328 = arith.addf %325, %327 : vector<8x64xf32>
    %329 = vector.extract_strided_slice %321 {offsets = [0, 128], sizes = [8, 64], strides = [1, 1]} : vector<8x192xf32> to vector<8x64xf32>
    %330 = math.tanh %328 : vector<8x64xf32>
    %331 = arith.mulf %329, %330 : vector<8x64xf32>
    %c14_i32 = arith.constant 14 : i32
    %c8_i32_67 = arith.constant 8 : i32
    %332 = arith.muli %c14_i32, %c8_i32_67 : i32
    %333 = tpu.assume_multiple %332, 8 : i32
    %334 = arith.index_cast %333 : i32 to index
    %c0_68 = arith.constant 0 : index
    %335 = vector.load %arg6[%334, %c0_68] : memref<136x256xf32, #tpu.memory_space<vmem>>, vector<8x256xf32>
    %336 = arith.truncf %331 : vector<8x64xf32> to vector<8x64xbf16>
    %cst_69 = arith.constant dense<0.000000e+00> : vector<8x256xf32>
    %337 = tpu.matmul %336, %7, %cst_69 {dimension_numbers = #tpu.dot_dimension_numbers<[1], [0], [0], [1], [0, 0, 1, 1], [], []>} : vector<8x64xbf16>, vector<64x256xbf16>, vector<8x256xf32> -> vector<8x256xf32>
    %338 = arith.addf %335, %337 : vector<8x256xf32>
    %339 = vector.extract_strided_slice %338 {offsets = [0, 0], sizes = [8, 192], strides = [1, 1]} : vector<8x256xf32> to vector<8x192xf32>
    %340 = arith.negf %339 : vector<8x192xf32>
    %341 = math.exp %340 : vector<8x192xf32>
    %cst_70 = arith.constant 1.000000e+00 : f32
    %342 = vector.broadcast %cst_70 : f32 to vector<8x192xf32>
    %343 = arith.addf %342, %341 : vector<8x192xf32>
    %344 = arith.divf %342, %343 : vector<8x192xf32>
    %345 = vector.extract_strided_slice %338 {offsets = [0, 192], sizes = [8, 64], strides = [1, 1]} : vector<8x256xf32> to vector<8x64xf32>
    %346 = math.tanh %345 : vector<8x64xf32>
    %347 = vector.extract_strided_slice %344 {offsets = [0, 64], sizes = [8, 64], strides = [1, 1]} : vector<8x192xf32> to vector<8x64xf32>
    %348 = arith.mulf %347, %328 : vector<8x64xf32>
    %349 = vector.extract_strided_slice %344 {offsets = [0, 0], sizes = [8, 64], strides = [1, 1]} : vector<8x192xf32> to vector<8x64xf32>
    %350 = arith.mulf %349, %346 : vector<8x64xf32>
    %351 = arith.addf %348, %350 : vector<8x64xf32>
    %352 = vector.extract_strided_slice %344 {offsets = [0, 128], sizes = [8, 64], strides = [1, 1]} : vector<8x192xf32> to vector<8x64xf32>
    %353 = math.tanh %351 : vector<8x64xf32>
    %354 = arith.mulf %352, %353 : vector<8x64xf32>
    %c15_i32 = arith.constant 15 : i32
    %c8_i32_71 = arith.constant 8 : i32
    %355 = arith.muli %c15_i32, %c8_i32_71 : i32
    %356 = tpu.assume_multiple %355, 8 : i32
    %357 = arith.index_cast %356 : i32 to index
    %c0_72 = arith.constant 0 : index
    %358 = vector.load %arg6[%357, %c0_72] : memref<136x256xf32, #tpu.memory_space<vmem>>, vector<8x256xf32>
    %359 = arith.truncf %354 : vector<8x64xf32> to vector<8x64xbf16>
    %cst_73 = arith.constant dense<0.000000e+00> : vector<8x256xf32>
    %360 = tpu.matmul %359, %7, %cst_73 {dimension_numbers = #tpu.dot_dimension_numbers<[1], [0], [0], [1], [0, 0, 1, 1], [], []>} : vector<8x64xbf16>, vector<64x256xbf16>, vector<8x256xf32> -> vector<8x256xf32>
    %361 = arith.addf %358, %360 : vector<8x256xf32>
    %362 = vector.extract_strided_slice %361 {offsets = [0, 0], sizes = [8, 192], strides = [1, 1]} : vector<8x256xf32> to vector<8x192xf32>
    %363 = arith.negf %362 : vector<8x192xf32>
    %364 = math.exp %363 : vector<8x192xf32>
    %cst_74 = arith.constant 1.000000e+00 : f32
    %365 = vector.broadcast %cst_74 : f32 to vector<8x192xf32>
    %366 = arith.addf %365, %364 : vector<8x192xf32>
    %367 = arith.divf %365, %366 : vector<8x192xf32>
    %368 = vector.extract_strided_slice %361 {offsets = [0, 192], sizes = [8, 64], strides = [1, 1]} : vector<8x256xf32> to vector<8x64xf32>
    %369 = math.tanh %368 : vector<8x64xf32>
    %370 = vector.extract_strided_slice %367 {offsets = [0, 64], sizes = [8, 64], strides = [1, 1]} : vector<8x192xf32> to vector<8x64xf32>
    %371 = arith.mulf %370, %351 : vector<8x64xf32>
    %372 = vector.extract_strided_slice %367 {offsets = [0, 0], sizes = [8, 64], strides = [1, 1]} : vector<8x192xf32> to vector<8x64xf32>
    %373 = arith.mulf %372, %369 : vector<8x64xf32>
    %374 = arith.addf %371, %373 : vector<8x64xf32>
    %375 = vector.extract_strided_slice %367 {offsets = [0, 128], sizes = [8, 64], strides = [1, 1]} : vector<8x192xf32> to vector<8x64xf32>
    %376 = math.tanh %374 : vector<8x64xf32>
    %377 = arith.mulf %375, %376 : vector<8x64xf32>
    %c16_i32 = arith.constant 16 : i32
    %c8_i32_75 = arith.constant 8 : i32
    %378 = arith.muli %c16_i32, %c8_i32_75 : i32
    %379 = tpu.assume_multiple %378, 8 : i32
    %380 = arith.index_cast %379 : i32 to index
    %c0_76 = arith.constant 0 : index
    %381 = vector.load %arg6[%380, %c0_76] : memref<136x256xf32, #tpu.memory_space<vmem>>, vector<8x256xf32>
    %382 = arith.truncf %377 : vector<8x64xf32> to vector<8x64xbf16>
    %cst_77 = arith.constant dense<0.000000e+00> : vector<8x256xf32>
    %383 = tpu.matmul %382, %7, %cst_77 {dimension_numbers = #tpu.dot_dimension_numbers<[1], [0], [0], [1], [0, 0, 1, 1], [], []>} : vector<8x64xbf16>, vector<64x256xbf16>, vector<8x256xf32> -> vector<8x256xf32>
    %384 = arith.addf %381, %383 : vector<8x256xf32>
    %385 = vector.extract_strided_slice %384 {offsets = [0, 0], sizes = [8, 192], strides = [1, 1]} : vector<8x256xf32> to vector<8x192xf32>
    %386 = arith.negf %385 : vector<8x192xf32>
    %387 = math.exp %386 : vector<8x192xf32>
    %cst_78 = arith.constant 1.000000e+00 : f32
    %388 = vector.broadcast %cst_78 : f32 to vector<8x192xf32>
    %389 = arith.addf %388, %387 : vector<8x192xf32>
    %390 = arith.divf %388, %389 : vector<8x192xf32>
    %391 = vector.extract_strided_slice %384 {offsets = [0, 192], sizes = [8, 64], strides = [1, 1]} : vector<8x256xf32> to vector<8x64xf32>
    %392 = math.tanh %391 : vector<8x64xf32>
    %393 = vector.extract_strided_slice %390 {offsets = [0, 64], sizes = [8, 64], strides = [1, 1]} : vector<8x192xf32> to vector<8x64xf32>
    %394 = arith.mulf %393, %374 : vector<8x64xf32>
    %395 = vector.extract_strided_slice %390 {offsets = [0, 0], sizes = [8, 64], strides = [1, 1]} : vector<8x192xf32> to vector<8x64xf32>
    %396 = arith.mulf %395, %392 : vector<8x64xf32>
    %397 = arith.addf %394, %396 : vector<8x64xf32>
    %398 = vector.extract_strided_slice %390 {offsets = [0, 128], sizes = [8, 64], strides = [1, 1]} : vector<8x192xf32> to vector<8x64xf32>
    %399 = math.tanh %397 : vector<8x64xf32>
    %400 = arith.mulf %398, %399 : vector<8x64xf32>
    %c17_i32 = arith.constant 17 : i32
    %401 = vector.extract_strided_slice %400 {offsets = [0, 0], sizes = [8, 32], strides = [1, 1]} : vector<8x64xf32> to vector<8x32xf32>
    %402 = vector.extract_strided_slice %400 {offsets = [0, 32], sizes = [8, 32], strides = [1, 1]} : vector<8x64xf32> to vector<8x32xf32>
    %403 = arith.addf %401, %402 : vector<8x32xf32>
    %c0_79 = arith.constant 0 : index
    %c0_80 = arith.constant 0 : index
    %c0_81 = arith.constant 0 : index
    %404 = vector.load %arg1[%c0_79, %c0_80, %c0_81] : memref<8x8x32xf32, #tpu.memory_space<vmem>>, vector<8x8x32xf32>
    %405 = vector.shape_cast %403 : vector<8x32xf32> to vector<8x1x32xf32>
    %406 = vector.broadcast %405 : vector<8x1x32xf32> to vector<8x8x32xf32>
    %407 = arith.mulf %404, %406 : vector<8x8x32xf32>
    %cst_82 = arith.constant dense<0.000000e+00> : vector<8x8xf32>
    %408 = vector.multi_reduction <add>, %407, %cst_82 [2] : vector<8x8x32xf32> to vector<8x8xf32>
    %c0_83 = arith.constant 0 : index
    %c0_84 = arith.constant 0 : index
    %409 = vector.load %arg5[%c0_83, %c0_84] : memref<8x8xf32, #tpu.memory_space<vmem>>, vector<8x8xf32>
    tpu.vector_store %arg5[%c0_83, %c0_84], %408 {strides = array<i32>} : memref<8x8xf32, #tpu.memory_space<vmem>>, vector<8x8xf32>,
    return
  }
}

</mosaic_0001>

<bundles_post_ra>
// kernel: rnn_judge_forward.1
= control target key start
LH: loop header
LB: loop body
LE: loop exit
PB: predicated region body
PF: predicated region fallthrough
CT: control target
= control target key end

     0   :  { %v2313_v1 = vmov 0   ;;  %vm141_vm0 = vcmask 523264   ;;  %v48_v18 = vlaneseq  ;;  %vm1876_vm1 = vcmask 261120   ;;  %s2886_s2 = inlined_call_operand.vmem [shape: bf16[64,256], index: 2, kind: input, shape index: {}]   ;;  %s2887_s3 = inlined_call_operand.vmem [shape: bf16[64,256], index: 3, kind: input, shape index: {}]   ;;  %s2888_s0 = inlined_call_operand.vmem [shape: bf16[136,64], index: 0, kind: input, shape index: {}]   ;;  %s2889_s4 = inlined_call_operand.vmem [shape: f32[1,256], index: 4, kind: input, shape index: {}]   ;;  %s2890_s1 = inlined_call_operand.vmem [shape: f32[8,8,32], index: 1, kind: input, shape index: {}]   ;;  %s2891_s5 = inlined_call_operand.vmem [shape: f32[8,8], index: 5, kind: output, shape index: {}]  }
   0x1   :  { %v2068_v0 = vld [vmem:[%s2886_s2 + $0x34] ss:$8 sps:$4 sm:$0xff]   ;;  %201 = vmatprep.mubr.bf16.mxu0 %v2313_v1  ;;  %412 = vmatprep.mubr.bf16.mxu1 %v2313_v1  ;;  %v2072_v3 = vld [vmem:[%s2886_s2 + $0x30] ss:$8 sps:$4 sm:$0xff]   ;;  %v2074_v5 = vld [vmem:[%s2886_s2 + $0x24] ss:$8 sps:$4 sm:$0xff]  }
   0x2   :  { %v2355_v2 = vld [vmem:[%s2887_s3 + $0x34] ss:$8 sps:$4 sm:$0xff]   ;;  %177 = vmatprep.subr.bf16.mxu0 %v2068_v0  ;;  %v2363_v4 = vld [vmem:[%s2887_s3 + $0x30] ss:$8 sps:$4 sm:$0xff]   ;;  %v2373_v6 = vld [vmem:[%s2887_s3 + $0x24] ss:$8 sps:$4 sm:$0xff]  }
   0x3   :  { %388 = vmatprep.subr.bf16.mxu1 %v2355_v2  ;;  %178 = vmatpush1.bf16.msra.mxu0 %v2072_v3  ;;  %v2078_v7 = vld [vmem:[%s2886_s2 + $0x20] ss:$8 sps:$4 sm:$0xff]   ;;  %v2080_v9 = vld [vmem:[%s2886_s2 + $0x14] ss:$8 sps:$4 sm:$0xff]   ;;  %v2084_v11 = vld [vmem:[%s2886_s2 + $0x10] ss:$8 sps:$4 sm:$0xff]  }
   0x4   :  { %389 = vmatpush1.bf16.msra.mxu1 %v2363_v4  ;;  %179 = vmatprep.subr.bf16.mxu0 %v2074_v5  ;;  %v2381_v8 = vld [vmem:[%s2887_s3 + $0x20] ss:$8 sps:$4 sm:$0xff]   ;;  %v2390_v10 = vld [vmem:[%s2887_s3 + $0x14] ss:$8 sps:$4 sm:$0xff]   ;;  %v2398_v12 = vld [vmem:[%s2887_s3 + $0x10] ss:$8 sps:$4 sm:$0xff]  }
   0x5   :  { %390 = vmatprep.subr.bf16.mxu1 %v2373_v6  ;;  %v2086_v13 = vld [vmem:[%s2886_s2 + $0x4] ss:$8 sps:$4 sm:$0xff]   ;;  %v2090_v15 = vld [vmem:[%s2886_s2] ss:$8 sps:$4 sm:$0xff]   ;;  %v2447_v19 = vshrl.u32 %v48_v18, 7  ;;  %vm1943_vm2 = vcmask 1041409  }
   0x6   :  { %v2408_v14 = vld [vmem:[%s2887_s3 + $0x4] ss:$8 sps:$4 sm:$0xff]   ;;  %v2416_v16 = vld [vmem:[%s2887_s3] ss:$8 sps:$4 sm:$0xff]   ;;  %vm1945_vm3 = vcmask 1042434   ;;  %vm1947_vm4 = vcmask 1043459  }
   0x7   :  { %180 = vmatpush1.bf16.msra.mxu0 %v2078_v7  ;;  %v2092_v17 = vld [vmem:[%s2888_s0] sm:$0xff]   ;;  %v2450_v20 = vsub.s32 0, %v2447_v19  ;;  %v54_v22 = vsub.s32 1, %v2447_v19  ;;  %vm1949_vm5 = vcmask 1044484   ;;  %vm1951_vm6 = vcmask 1045509  }
   0x8   :  { %391 = vmatpush1.bf16.msra.mxu1 %v2381_v8  ;;  %181 = vmatprep.subr.bf16.mxu0 %v2080_v9  ;;  %v46_v21 = vld [vmem:[%s2889_s4] sm:$0x3]  ;;  %s2314_s4 = smov 64   ;;  %vm1953_vm7 = vcmask 1046534   ;;  %vm1955_vm8 = vcmask 1047559   ;;  %vm1958_vm9 = vcmask 64512  }
   0x9   :  { %392 = vmatprep.subr.bf16.mxu1 %v2390_v10  ;;  %v2457_v23 = vrot.slane %v46_v21, %v2450_v20  ;;  %v2459_v24 = vrot.slane %v46_v21, %v54_v22 }
   0xb   :  { %182 = vmatpush1.bf16.msra.mxu0 %v2084_v11 }
   0xc   :  { %393 = vmatpush1.bf16.msra.mxu1 %v2398_v12  ;;  %183 = vmatprep.subr.bf16.mxu0 %v2086_v13  ;;  %v2093_v13 = vld [vmem:[%s2888_s0 + $0x8] sm:$0xff]  }
   0xd   :  { %394 = vmatprep.subr.bf16.mxu1 %v2408_v14 }
   0xf   :  { %184 = vmatpush1.bf16.msra.mxu0 %v2090_v15 }
  0x10   :  { %395 = vmatpush1.bf16.msra.mxu1 %v2416_v16  ;;  %798 = vmatprep.subr.bf16.mxu0 %v2355_v2 }
  0x11   :  { %470 = vmatprep.subr.bf16.mxu1 %v2355_v2 }
  0x12   :  { %1997 = vmatmul.mubr.msk.bf16.vlgmr.msra.gmra.mxu0 %vm141_vm0, %v2092_v17 }
  0x13   :  { %413 = vmatmul.mubr.bf16.vlgmr.msra.gmra.mxu1 %v2313_v1  ;;  %211 = vmatprep.mubr.bf16.mxu0 %v2313_v1 }
  0x14   :  { %471 = vmatpush1.bf16.msra.mxu1 %v2363_v4  ;;  %494 = vmatprep.mubr.bf16.mxu1 %v2313_v1 }
  0x15   :  { %472 = vmatprep.subr.bf16.mxu1 %v2373_v6  ;;  %799 = vmatpush1.bf16.msra.mxu0 %v2363_v4 }
  0x16   :  { %800 = vmatprep.subr.bf16.mxu0 %v2373_v6 }
  0x18   :  { %473 = vmatpush1.bf16.msra.mxu1 %v2381_v8 }
  0x19   :  { %474 = vmatprep.subr.bf16.mxu1 %v2390_v10  ;;  %801 = vmatpush1.bf16.msra.mxu0 %v2381_v8 }
  0x1a   :  { %802 = vmatprep.subr.bf16.mxu0 %v2390_v10  ;;  %1998 = vmatmul.mubr.msk.bf16.gmra.mxu0 %vm141_vm0, %v2093_v13 }
  0x1b   :  { %221 = vmatprep.mubr.bf16.mxu0 %v2313_v1 }
  0x1c   :  { %475 = vmatpush1.bf16.msra.mxu1 %v2398_v12 }
  0x1d   :  { %476 = vmatprep.subr.bf16.mxu1 %v2408_v14  ;;  %803 = vmatpush1.bf16.msra.mxu0 %v2398_v12 }
  0x1e   :  { %804 = vmatprep.subr.bf16.mxu0 %v2408_v14 }
  0x20   :  { %477 = vmatpush1.bf16.msra.mxu1 %v2416_v16 }
  0x21   :  { %552 = vmatprep.subr.bf16.mxu1 %v2355_v2  ;;  %805 = vmatpush1.bf16.msra.mxu0 %v2416_v16 }
  0x22   :  { %962 = vmatprep.subr.bf16.mxu0 %v2355_v2 }
  0xd2   :  { %v203_v25 = vpop.f32.mrf.mxu0 }
  0xd3   :  { %v414_v26 = vpop.f32.mrf.mxu1  ;;  %v204_v27 = vadd.f32 %v203_v25, %v2457_v23 }
  0xd4   :  { %v205_v28 = vpop.f32.mrf.mxu0 }
  0xd5   :  { %v416_v29 = vpop.f32.mrf.mxu1  ;;  %v421_v30 = vadd.f32 %v414_v26, %v204_v27  ;;  %v206_v31 = vadd.f32 %v205_v28, %v2459_v24 }
  0xd6   :  { %v207_v53 = vpop.f32.mrf.mxu0 }
  0xd7   :  { %v418_v32 = vpop.f32.mrf.mxu1  ;;  %v422_v33 = vadd.f32 %v416_v29, %v206_v31  ;;  %v2014_v36 = vmul.f32 -1.442695, %v421_v30  ;;  %v208_v55 = vadd.f32 %v207_v53, %v2457_v23 }
  0xd8   :  { %v209_v54 = vpop.f32.mrf.mxu0 }
  0xd9   :  { %v419_v34 = vpop.f32.mrf.mxu1  ;;  %2101 = vtanh.f32 %v422_v33  ;;  %v2015_v46 = vmul.f32 -1.442695, %v422_v33  ;;  %v210_v57 = vadd.f32 %v209_v54, %v2459_v24 }
  0xda   :  { %2103 = vpow2.f32 %v2014_v36  ;;  %v213_v32 = vpop.f32.mrf.mxu0 }
  0xdb   :  { %v214_v33 = vadd.f32 %v213_v32, %v2457_v23 }
  0xdc   :  { %v215_v34 = vpop.f32.mrf.mxu0 }
  0xdd   :  { %v216_v36 = vadd.f32 %v215_v34, %v2459_v24 }
  0xe6   :  { %v2102_v35 = vpop.eup %2101 }
  0xe7   :  { %438 = vrot.lane.b32.xlu0 %v2102_v35, %s2314_s4  ;;  %v2104_v37 = vpop.eup %2103 }
  0xe8   :  { %v429_v38 = vadd.f32 1.0, %v2104_v37 }
  0xea   :  { %2105 = vrcp.f32 %v429_v38 }
  0xf7   :  { %v2106_v39 = vpop.eup %2105 }
  0xf8   :  { %v436_v42 = vmul.f32 0.0, %v2106_v39 }
 0x159   :  { %v439_v40 = vpop.permute.xlu0 %438 }
 0x15a   :  { %v441_v41 = vmul.f32 %v2106_v39, %v439_v40 }
 0x15c   :  { %443 = vrot.lane.b32.xlu0 %v441_v41, %s2314_s4 }
 0x1ce   :  { %v444_v43 = vpop.permute.xlu0 %443 }
 0x1cf   :  { %v446_v44 = vadd.f32 %v444_v43, %v436_v42 }
 0x1d1   :  { %2107 = vtanh.f32 %v446_v44 }
 0x1d2   :  { %2109 = vpow2.f32 %v2015_v46 }
 0x1de   :  { %v2108_v45 = vpop.eup %2107 }
 0x1df   :  { %449 = vrot.lane.b32.xlu1 %v2108_v45, %s2314_s4  ;;  %v2110_v47 = vpop.eup %2109 }
 0x1e0   :  { %v430_v48 = vadd.f32 1.0, %v2110_v47 }
 0x1e2   :  { %2111 = vrcp.f32 %v430_v48 }
 0x1ef   :  { %v2112_v49 = vpop.eup %2111 }
 0x251   :  { %v450_v50 = vpop.permute.xlu1 %449 }
 0x252   :  { %v452_v51 = vmul.f32 %v2112_v49, %v450_v50 }
 0x254   :  { %v458_v52 = vpack.c.bf16 %v452_v51, %v452_v51 }
 0x256   :  { %2016 = vmatmul.mubr.msk.bf16.vlgmr.msra.gmra.mxu1 %vm141_vm0, %v458_v52 }
 0x257   :  { %553 = vmatpush1.bf16.msra.mxu1 %v2363_v4  ;;  %576 = vmatprep.mubr.bf16.mxu1 %v2313_v1 }
 0x258   :  { %554 = vmatprep.subr.bf16.mxu1 %v2373_v6 }
 0x25b   :  { %555 = vmatpush1.bf16.msra.mxu1 %v2381_v8 }
 0x25c   :  { %556 = vmatprep.subr.bf16.mxu1 %v2390_v10 }
 0x25f   :  { %557 = vmatpush1.bf16.msra.mxu1 %v2398_v12 }
 0x260   :  { %558 = vmatprep.subr.bf16.mxu1 %v2408_v14 }
 0x263   :  { %559 = vmatpush1.bf16.msra.mxu1 %v2416_v16 }
 0x264   :  { %634 = vmatprep.subr.bf16.mxu1 %v2355_v2 }
 0x316   :  { %v496_v56 = vpop.f32.mrf.mxu1 }
 0x317   :  { %v503_v58 = vadd.f32 %v496_v56, %v208_v55 }
 0x318   :  { %v498_v59 = vpop.f32.mrf.mxu1 }
 0x319   :  { %v504_v60 = vadd.f32 %v498_v59, %v210_v57  ;;  %v2017_v0 = vmul.f32 -1.442695, %v503_v58 }
 0x31a   :  { %v500_v61 = vpop.f32.mrf.mxu1 }
 0x31b   :  { %2113 = vtanh.f32 %v504_v60  ;;  %v2018_v25 = vmul.f32 -1.442695, %v504_v60  ;;  %v217_v60 = vpop.f32.mrf.mxu0 }
 0x31c   :  { %v501_v62 = vpop.f32.mrf.mxu1  ;;  %2115 = vpow2.f32 %v2017_v0 }
 0x31d   :  { %v219_v61 = vpop.f32.mrf.mxu0  ;;  %v218_v62 = vadd.f32 %v217_v60, %v2457_v23  ;;  %v2099_v60 = vld [vmem:[%s2888_s0 + $0x38] sm:$0xff]  }
 0x31e   :  { %v220_v0 = vadd.f32 %v219_v61, %v2459_v24  ;;  %v2100_v61 = vld [vmem:[%s2888_s0 + $0x40] ss:$0 sps:$4 sm:$0xff]  }
 0x328   :  { %v2114_v63 = vpop.eup %2113 }
 0x329   :  { %520 = vrot.lane.b32.xlu1 %v2114_v63, %s2314_s4  ;;  %v2116_v3 = vpop.eup %2115 }
 0x32a   :  { %v511_v5 = vadd.f32 1.0, %v2116_v3 }
 0x32c   :  { %2117 = vrcp.f32 %v511_v5 }
 0x339   :  { %v2118_v7 = vpop.eup %2117 }
 0x33a   :  { %v518_v15 = vmul.f32 %v2118_v7, %v446_v44 }
 0x39b   :  { %v521_v9 = vpop.permute.xlu1 %520 }
 0x39c   :  { %v523_v11 = vmul.f32 %v2118_v7, %v521_v9 }
 0x39e   :  { %525 = vrot.lane.b32.xlu0 %v523_v11, %s2314_s4 }
 0x410   :  { %v526_v17 = vpop.permute.xlu0 %525 }
 0x411   :  { %v528_v21 = vadd.f32 %v526_v17, %v518_v15 }
 0x413   :  { %2119 = vtanh.f32 %v528_v21 }
 0x414   :  { %2121 = vpow2.f32 %v2018_v25 }
 0x420   :  { %v2120_v22 = vpop.eup %2119 }
 0x421   :  { %531 = vrot.lane.b32.xlu1 %v2120_v22, %s2314_s4  ;;  %v2122_v26 = vpop.eup %2121 }
 0x422   :  { %v512_v27 = vadd.f32 1.0, %v2122_v26 }
 0x424   :  { %2123 = vrcp.f32 %v512_v27  ;;  %v2094_v27 = vld [vmem:[%s2888_s0 + $0x10] sm:$0xff]  }
 0x425   :  { %1999 = vmatmul.mubr.msk.bf16.gmra.mxu0 %vm141_vm0, %v2094_v27 }
 0x426   :  { %231 = vmatprep.mubr.bf16.mxu0 %v2313_v1 }
 0x431   :  { %v2124_v28 = vpop.eup %2123 }
 0x493   :  { %v532_v29 = vpop.permute.xlu1 %531 }
 0x494   :  { %v534_v30 = vmul.f32 %v2124_v28, %v532_v29 }
 0x496   :  { %v540_v31 = vpack.c.bf16 %v534_v30, %v534_v30 }
 0x498   :  { %2019 = vmatmul.mubr.msk.bf16.vlgmr.msra.gmra.mxu1 %vm141_vm0, %v540_v31 }
 0x499   :  { %635 = vmatpush1.bf16.msra.mxu1 %v2363_v4  ;;  %658 = vmatprep.mubr.bf16.mxu1 %v2313_v1 }
 0x49a   :  { %636 = vmatprep.subr.bf16.mxu1 %v2373_v6 }
 0x49d   :  { %637 = vmatpush1.bf16.msra.mxu1 %v2381_v8 }
 0x49e   :  { %638 = vmatprep.subr.bf16.mxu1 %v2390_v10 }
 0x4a1   :  { %639 = vmatpush1.bf16.msra.mxu1 %v2398_v12 }
 0x4a2   :  { %640 = vmatprep.subr.bf16.mxu1 %v2408_v14 }
 0x4a5   :  { %641 = vmatpush1.bf16.msra.mxu1 %v2416_v16 }
 0x4a6   :  { %716 = vmatprep.subr.bf16.mxu1 %v2355_v2 }
 0x558   :  { %v578_v35 = vpop.f32.mrf.mxu1 }
 0x559   :  { %v585_v37 = vadd.f32 %v578_v35, %v214_v33 }
 0x55a   :  { %v580_v38 = vpop.f32.mrf.mxu1 }
 0x55b   :  { %v586_v39 = vadd.f32 %v580_v38, %v216_v36  ;;  %v2020_v43 = vmul.f32 -1.442695, %v585_v37 }
 0x55c   :  { %v582_v40 = vpop.f32.mrf.mxu1 }
 0x55d   :  { %2125 = vtanh.f32 %v586_v39  ;;  %v2021_v53 = vmul.f32 -1.442695, %v586_v39  ;;  %v223_v39 = vpop.f32.mrf.mxu0 }
 0x55e   :  { %v583_v41 = vpop.f32.mrf.mxu1  ;;  %2127 = vpow2.f32 %v2020_v43  ;;  %v224_v40 = vadd.f32 %v223_v39, %v2457_v23 }
 0x55f   :  { %v225_v41 = vpop.f32.mrf.mxu0 }
 0x560   :  { %v226_v43 = vadd.f32 %v225_v41, %v2459_v24 }
 0x56a   :  { %v2126_v42 = vpop.eup %2125 }
 0x56b   :  { %602 = vrot.lane.b32.xlu0 %v2126_v42, %s2314_s4  ;;  %v2128_v44 = vpop.eup %2127 }
 0x56c   :  { %v593_v45 = vadd.f32 1.0, %v2128_v44 }
 0x56e   :  { %2129 = vrcp.f32 %v593_v45 }
 0x57b   :  { %v2130_v46 = vpop.eup %2129 }
 0x57c   :  { %v600_v49 = vmul.f32 %v2130_v46, %v528_v21 }
 0x5dd   :  { %v603_v47 = vpop.permute.xlu0 %602 }
 0x5de   :  { %v605_v48 = vmul.f32 %v2130_v46, %v603_v47 }
 0x5e0   :  { %607 = vrot.lane.b32.xlu1 %v605_v48, %s2314_s4 }
 0x652   :  { %v608_v50 = vpop.permute.xlu1 %607 }
 0x653   :  { %v610_v51 = vadd.f32 %v608_v50, %v600_v49 }
 0x655   :  { %2131 = vtanh.f32 %v610_v51 }
 0x656   :  { %2133 = vpow2.f32 %v2021_v53 }
 0x662   :  { %v2132_v52 = vpop.eup %2131 }
 0x663   :  { %613 = vrot.lane.b32.xlu0 %v2132_v52, %s2314_s4  ;;  %v2134_v54 = vpop.eup %2133 }
 0x664   :  { %v594_v55 = vadd.f32 1.0, %v2134_v54 }
 0x666   :  { %2135 = vrcp.f32 %v594_v55 }
 0x673   :  { %v2136_v56 = vpop.eup %2135 }
 0x6d5   :  { %v614_v57 = vpop.permute.xlu0 %613 }
 0x6d6   :  { %v616_v58 = vmul.f32 %v2136_v56, %v614_v57  ;;  %v2095_v56 = vld [vmem:[%s2888_s0 + $0x18] sm:$0xff]   ;;  %v2096_v57 = vld [vmem:[%s2888_s0 + $0x20] sm:$0xff]  }
 0x6d7   :  { %2000 = vmatmul.mubr.msk.bf16.gmra.mxu0 %vm141_vm0, %v2095_v56 }
 0x6d8   :  { %v622_v59 = vpack.c.bf16 %v616_v58, %v616_v58  ;;  %241 = vmatprep.mubr.bf16.mxu0 %v2313_v1  ;;  %v2097_v58 = vld [vmem:[%s2888_s0 + $0x28] sm:$0xff]  }
 0x6da   :  { %2022 = vmatmul.mubr.msk.bf16.vlgmr.msra.gmra.mxu1 %vm141_vm0, %v622_v59  ;;  %v2098_v59 = vld [vmem:[%s2888_s0 + $0x30] sm:$0xff]  }
 0x6db   :  { %717 = vmatpush1.bf16.msra.mxu1 %v2363_v4  ;;  %740 = vmatprep.mubr.bf16.mxu1 %v2313_v1 }
 0x6dc   :  { %718 = vmatprep.subr.bf16.mxu1 %v2373_v6 }
 0x6df   :  { %719 = vmatpush1.bf16.msra.mxu1 %v2381_v8  ;;  %2001 = vmatmul.mubr.msk.bf16.gmra.mxu0 %vm141_vm0, %v2096_v57 }
 0x6e0   :  { %720 = vmatprep.subr.bf16.mxu1 %v2390_v10  ;;  %251 = vmatprep.mubr.bf16.mxu0 %v2313_v1 }
 0x6e3   :  { %721 = vmatpush1.bf16.msra.mxu1 %v2398_v12 }
 0x6e4   :  { %722 = vmatprep.subr.bf16.mxu1 %v2408_v14 }
 0x6e7   :  { %723 = vmatpush1.bf16.msra.mxu1 %v2416_v16  ;;  %2002 = vmatmul.mubr.msk.bf16.gmra.mxu0 %vm141_vm0, %v2097_v58 }
 0x6e8   :  { %880 = vmatprep.subr.bf16.mxu1 %v2355_v2  ;;  %261 = vmatprep.mubr.bf16.mxu0 %v2313_v1 }
 0x6ef   :  { %2003 = vmatmul.mubr.msk.bf16.gmra.mxu0 %vm141_vm0, %v2098_v59 }
 0x6f0   :  { %271 = vmatprep.mubr.bf16.mxu0 %v2313_v1 }
 0x6f7   :  { %2004 = vmatmul.mubr.msk.bf16.gmra.mxu0 %vm141_vm0, %v2099_v60 }
 0x6f8   :  { %281 = vmatprep.mubr.bf16.mxu0 %v2313_v1 }
 0x6ff   :  { %2005 = vmatmul.mubr.msk.bf16.gmra.mxu0 %vm141_vm0, %v2100_v61 }
 0x700   :  { %822 = vmatprep.mubr.bf16.mxu0 %v2313_v1 }
 0x79a   :  { %v660_v63 = vpop.f32.mrf.mxu1 }
 0x79b   :  { %v667_v3 = vadd.f32 %v660_v63, %v218_v62 }
 0x79c   :  { %v662_v5 = vpop.f32.mrf.mxu1 }
 0x79d   :  { %v668_v7 = vadd.f32 %v662_v5, %v220_v0  ;;  %v2023_v15 = vmul.f32 -1.442695, %v667_v3  ;;  %v227_v5 = vpop.f32.mrf.mxu0 }
 0x79e   :  { %v664_v9 = vpop.f32.mrf.mxu1 }
 0x79f   :  { %2137 = vtanh.f32 %v668_v7  ;;  %v2024_v32 = vmul.f32 -1.442695, %v668_v7  ;;  %v229_v7 = vpop.f32.mrf.mxu0 }
 0x7a0   :  { %v665_v11 = vpop.f32.mrf.mxu1  ;;  %2139 = vpow2.f32 %v2023_v15 }
 0x7a1   :  { %v2573_v9 = vpop.f32.mrf.mxu0 }
 0x7a3   :  { %v2575_v11 = vpop.f32.mrf.mxu0 }
 0x7ac   :  { %v2138_v13 = vpop.eup %2137 }
 0x7ad   :  { %684 = vrot.lane.b32.xlu1 %v2138_v13, %s2314_s4  ;;  %v2140_v17 = vpop.eup %2139  ;;  %v2577_v13 = vpop.f32.mrf.mxu0 }
 0x7ae   :  { %v675_v21 = vadd.f32 1.0, %v2140_v17 }
 0x7af   :  { %v2579_v15 = vpop.f32.mrf.mxu0 }
 0x7b0   :  { %2141 = vrcp.f32 %v675_v21 }
 0x7b1   :  { %v2581_v17 = vpop.f32.mrf.mxu0 }
 0x7b3   :  { %v2583_v21 = vpop.f32.mrf.mxu0 }
 0x7bd   :  { %v2142_v22 = vpop.eup %2141 }
 0x7be   :  { %v682_v28 = vmul.f32 %v2142_v22, %v610_v51 }
 0x81f   :  { %v685_v25 = vpop.permute.xlu1 %684 }
 0x820   :  { %v687_v26 = vmul.f32 %v2142_v22, %v685_v25  ;;  %v2585_v25 = vpop.f32.mrf.mxu0 }
 0x822   :  { %689 = vrot.lane.b32.xlu0 %v687_v26, %s2314_s4  ;;  %v2587_v26 = vpop.f32.mrf.mxu0 }
 0x824   :  { %v2589_v27 = vpop.f32.mrf.mxu0 }
 0x894   :  { %v690_v29 = vpop.permute.xlu0 %689 }
 0x895   :  { %v2520_v30 = vadd.f32 %v690_v29, %v682_v28  ;;  %v2591_v28 = vpop.f32.mrf.mxu0 }
 0x897   :  { %2143 = vtanh.f32 %v2520_v30  ;;  %v2593_v29 = vpop.f32.mrf.mxu0 }
 0x898   :  { %2145 = vpow2.f32 %v2024_v32 }
 0x8a4   :  { %v2144_v31 = vpop.eup %2143 }
 0x8a5   :  { %695 = vrot.lane.b32.xlu1 %v2144_v31, %s2314_s4  ;;  %v2146_v33 = vpop.eup %2145 }
 0x8a6   :  { %v676_v34 = vadd.f32 1.0, %v2146_v33 }
 0x8a8   :  { %2147 = vrcp.f32 %v676_v34 }
 0x8b5   :  { %v2148_v35 = vpop.eup %2147 }
 0x917   :  { %v696_v36 = vpop.permute.xlu1 %695 }
 0x918   :  { %v698_v37 = vmul.f32 %v2148_v35, %v696_v36 }
 0x91a   :  { %v704_v38 = vpack.c.bf16 %v698_v37, %v698_v37 }
 0x91c   :  { %2025 = vmatmul.mubr.msk.bf16.vlgmr.msra.gmra.mxu1 %vm141_vm0, %v704_v38 }
 0x91d   :  { %881 = vmatpush1.bf16.msra.mxu1 %v2363_v4  ;;  %904 = vmatprep.mubr.bf16.mxu1 %v2313_v1 }
 0x91e   :  { %882 = vmatprep.subr.bf16.mxu1 %v2373_v6 }
 0x921   :  { %883 = vmatpush1.bf16.msra.mxu1 %v2381_v8 }
 0x922   :  { %884 = vmatprep.subr.bf16.mxu1 %v2390_v10 }
 0x925   :  { %885 = vmatpush1.bf16.msra.mxu1 %v2398_v12 }
 0x926   :  { %886 = vmatprep.subr.bf16.mxu1 %v2408_v14 }
 0x929   :  { %887 = vmatpush1.bf16.msra.mxu1 %v2416_v16 }
 0x92a   :  { %1044 = vmatprep.subr.bf16.mxu1 %v2355_v2 }
 0x9dc   :  { %v742_v42 = vpop.f32.mrf.mxu1 }
 0x9dd   :  { %v749_v44 = vadd.f32 %v742_v42, %v224_v40 }
 0x9de   :  { %v744_v45 = vpop.f32.mrf.mxu1 }
 0x9df   :  { %v750_v46 = vadd.f32 %v744_v45, %v226_v43  ;;  %v2026_v50 = vmul.f32 -1.442695, %v749_v44 }
 0x9e0   :  { %v746_v47 = vpop.f32.mrf.mxu1 }
 0x9e1   :  { %2149 = vtanh.f32 %v750_v46  ;;  %v2027_v22 = vmul.f32 -1.442695, %v750_v46 }
 0x9e2   :  { %v747_v48 = vpop.f32.mrf.mxu1  ;;  %2151 = vpow2.f32 %v2026_v50 }
 0x9ee   :  { %v2150_v49 = vpop.eup %2149 }
 0x9ef   :  { %766 = vrot.lane.b32.xlu0 %v2150_v49, %s2314_s4  ;;  %v2152_v51 = vpop.eup %2151  ;;  %v228_v49 = vadd.f32 %v227_v5, %v2457_v23 }
 0x9f0   :  { %v757_v52 = vadd.f32 1.0, %v2152_v51  ;;  %v230_v51 = vadd.f32 %v229_v7, %v2459_v24 }
 0x9f2   :  { %2153 = vrcp.f32 %v757_v52 }
 0x9ff   :  { %v2154_v53 = vpop.eup %2153 }
 0xa00   :  { %v764_v62 = vmul.f32 %v2154_v53, %v2520_v30  ;;  %v2595_v30 = vpop.f32.mrf.mxu0 }
 0xa02   :  { %v2597_v31 = vpop.f32.mrf.mxu0 }
 0xa04   :  { %v2599_v32 = vpop.f32.mrf.mxu0 }
 0xa06   :  { %v2601_v34 = vpop.f32.mrf.mxu0 }
 0xa08   :  { %v2603_v35 = vpop.f32.mrf.mxu0 }
 0xa0a   :  { %v2605_v37 = vpop.f32.mrf.mxu0 }
 0xa0c   :  { %v2607_v38 = vpop.f32.mrf.mxu0 }
 0xa0e   :  { %v2609_v39 = vpop.f32.mrf.mxu0 }
 0xa10   :  { %v2611_v40 = vpop.f32.mrf.mxu0 }
 0xa12   :  { %v2613_v41 = vpop.f32.mrf.mxu0 }
 0xa14   :  { %v2615_v42 = vpop.f32.mrf.mxu0 }
 0xa16   :  { %v287_v43 = vpop.f32.mrf.mxu0 }
 0xa18   :  { %v288_v44 = vpop.f32.mrf.mxu0 }
 0xa61   :  { %v767_v54 = vpop.permute.xlu0 %766 }
 0xa62   :  { %v769_v55 = vmul.f32 %v2154_v53, %v767_v54 }
 0xa64   :  { %771 = vrot.lane.b32.xlu1 %v769_v55, %s2314_s4 }
 0xad6   :  { %v772_v63 = vpop.permute.xlu1 %771 }
 0xad7   :  { %v2569_v0 = vadd.f32 %v772_v63, %v764_v62 }
 0xad9   :  { %2155 = vtanh.f32 %v2569_v0 }
 0xada   :  { %2157 = vpow2.f32 %v2027_v22 }
 0xae6   :  { %v2156_v3 = vpop.eup %2155 }
 0xae7   :  { %777 = vrot.lane.b32.xlu0 %v2156_v3, %s2314_s4  ;;  %v2158_v33 = vpop.eup %2157 }
 0xae8   :  { %v758_v36 = vadd.f32 1.0, %v2158_v33 }
 0xaea   :  { %2159 = vrcp.f32 %v758_v36 }
 0xaf7   :  { %v2160_v45 = vpop.eup %2159 }
 0xb59   :  { %v778_v46 = vpop.permute.xlu0 %777 }
 0xb5a   :  { %v780_v47 = vmul.f32 %v2160_v45, %v778_v46 }
 0xb5c   :  { %v786_v48 = vpack.c.bf16 %v780_v47, %v780_v47 }
 0xb5e   :  { %2028 = vmatmul.mubr.msk.bf16.vlgmr.msra.gmra.mxu0 %vm141_vm0, %v786_v48 }
 0xb5f   :  { %963 = vmatpush1.bf16.msra.mxu0 %v2363_v4  ;;  %986 = vmatprep.mubr.bf16.mxu0 %v2313_v1 }
 0xb60   :  { %964 = vmatprep.subr.bf16.mxu0 %v2373_v6 }
 0xb63   :  { %965 = vmatpush1.bf16.msra.mxu0 %v2381_v8 }
 0xb64   :  { %966 = vmatprep.subr.bf16.mxu0 %v2390_v10 }
 0xb67   :  { %967 = vmatpush1.bf16.msra.mxu0 %v2398_v12 }
 0xb68   :  { %968 = vmatprep.subr.bf16.mxu0 %v2408_v14 }
 0xb6b   :  { %969 = vmatpush1.bf16.msra.mxu0 %v2416_v16 }
 0xb6c   :  { %1126 = vmatprep.subr.bf16.mxu0 %v2355_v2 }
 0xc1e   :  { %v824_v50 = vpop.f32.mrf.mxu0 }
 0xc1f   :  { %v831_v52 = vadd.f32 %v824_v50, %v228_v49  ;;  %v236_v49 = vadd.f32 %v2575_v11, %v2459_v24 }
 0xc20   :  { %v826_v53 = vpop.f32.mrf.mxu0 }
 0xc21   :  { %v832_v54 = vadd.f32 %v826_v53, %v230_v51  ;;  %v2029_v58 = vmul.f32 -1.442695, %v831_v52 }
 0xc22   :  { %v828_v55 = vpop.f32.mrf.mxu0 }
 0xc23   :  { %2161 = vtanh.f32 %v832_v54  ;;  %v2030_v33 = vmul.f32 -1.442695, %v832_v54 }
 0xc24   :  { %v829_v56 = vpop.f32.mrf.mxu0  ;;  %2163 = vpow2.f32 %v2029_v58 }
 0xc30   :  { %v2162_v57 = vpop.eup %2161 }
 0xc31   :  { %848 = vrot.lane.b32.xlu1 %v2162_v57, %s2314_s4  ;;  %v2164_v59 = vpop.eup %2163 }
 0xc32   :  { %v839_v60 = vadd.f32 1.0, %v2164_v59 }
 0xc34   :  { %2165 = vrcp.f32 %v839_v60 }
 0xc41   :  { %v2166_v61 = vpop.eup %2165 }
 0xc42   :  { %v846_v3 = vmul.f32 %v2166_v61, %v2569_v0  ;;  %v234_v0 = vadd.f32 %v2573_v9, %v2457_v23 }
 0xca3   :  { %v849_v62 = vpop.permute.xlu1 %848 }
 0xca4   :  { %v851_v63 = vmul.f32 %v2166_v61, %v849_v62 }
 0xca6   :  { %853 = vrot.lane.b32.xlu0 %v851_v63, %s2314_s4 }
 0xd18   :  { %v854_v5 = vpop.permute.xlu0 %853 }
 0xd19   :  { %v856_v7 = vadd.f32 %v854_v5, %v846_v3 }
 0xd1b   :  { %2167 = vtanh.f32 %v856_v7 }
 0xd1c   :  { %2169 = vpow2.f32 %v2030_v33 }
 0xd28   :  { %v2168_v22 = vpop.eup %2167 }
 0xd29   :  { %859 = vrot.lane.b32.xlu1 %v2168_v22, %s2314_s4  ;;  %v2170_v36 = vpop.eup %2169 }
 0xd2a   :  { %v840_v43 = vadd.f32 1.0, %v2170_v36 }
 0xd2c   :  { %2171 = vrcp.f32 %v840_v43 }
 0xd39   :  { %v2172_v44 = vpop.eup %2171 }
 0xd9b   :  { %v860_v45 = vpop.permute.xlu1 %859 }
 0xd9c   :  { %v862_v46 = vmul.f32 %v2172_v44, %v860_v45 }
 0xd9e   :  { %v868_v47 = vpack.c.bf16 %v862_v46, %v862_v46  ;;  %v240_v46 = vadd.f32 %v2579_v15, %v2459_v24 }
 0xda0   :  { %2031 = vmatmul.mubr.msk.bf16.vlgmr.msra.gmra.mxu1 %vm141_vm0, %v868_v47 }
 0xda1   :  { %1045 = vmatpush1.bf16.msra.mxu1 %v2363_v4  ;;  %1068 = vmatprep.mubr.bf16.mxu1 %v2313_v1 }
 0xda2   :  { %1046 = vmatprep.subr.bf16.mxu1 %v2373_v6 }
 0xda5   :  { %1047 = vmatpush1.bf16.msra.mxu1 %v2381_v8 }
 0xda6   :  { %1048 = vmatprep.subr.bf16.mxu1 %v2390_v10 }
 0xda9   :  { %1049 = vmatpush1.bf16.msra.mxu1 %v2398_v12 }
 0xdaa   :  { %1050 = vmatprep.subr.bf16.mxu1 %v2408_v14 }
 0xdad   :  { %1051 = vmatpush1.bf16.msra.mxu1 %v2416_v16 }
 0xdae   :  { %1208 = vmatprep.subr.bf16.mxu1 %v2355_v2 }
 0xe60   :  { %v906_v48 = vpop.f32.mrf.mxu1 }
 0xe61   :  { %v913_v50 = vadd.f32 %v906_v48, %v234_v0 }
 0xe62   :  { %v908_v51 = vpop.f32.mrf.mxu1 }
 0xe63   :  { %v914_v52 = vadd.f32 %v908_v51, %v236_v49  ;;  %v2032_v56 = vmul.f32 -1.442695, %v913_v50 }
 0xe64   :  { %v910_v53 = vpop.f32.mrf.mxu1 }
 0xe65   :  { %2173 = vtanh.f32 %v914_v52  ;;  %v2033_v3 = vmul.f32 -1.442695, %v914_v52 }
 0xe66   :  { %v911_v54 = vpop.f32.mrf.mxu1  ;;  %2175 = vpow2.f32 %v2032_v56 }
 0xe72   :  { %v2174_v55 = vpop.eup %2173 }
 0xe73   :  { %930 = vrot.lane.b32.xlu0 %v2174_v55, %s2314_s4  ;;  %v2176_v57 = vpop.eup %2175 }
 0xe74   :  { %v921_v58 = vadd.f32 1.0, %v2176_v57 }
 0xe76   :  { %2177 = vrcp.f32 %v921_v58 }
 0xe83   :  { %v2178_v59 = vpop.eup %2177 }
 0xe84   :  { %v928_v11 = vmul.f32 %v2178_v59, %v856_v7  ;;  %v238_v7 = vadd.f32 %v2577_v13, %v2457_v23 }
 0xee5   :  { %v931_v9 = vpop.permute.xlu0 %930 }
 0xee6   :  { %v933_v60 = vmul.f32 %v2178_v59, %v931_v9 }
 0xee8   :  { %935 = vrot.lane.b32.xlu1 %v933_v60, %s2314_s4 }
 0xf5a   :  { %v936_v61 = vpop.permute.xlu1 %935 }
 0xf5b   :  { %v938_v62 = vadd.f32 %v936_v61, %v928_v11 }
 0xf5d   :  { %2179 = vtanh.f32 %v938_v62 }
 0xf5e   :  { %2181 = vpow2.f32 %v2033_v3 }
 0xf6a   :  { %v2180_v63 = vpop.eup %2179 }
 0xf6b   :  { %941 = vrot.lane.b32.xlu0 %v2180_v63, %s2314_s4  ;;  %v2182_v5 = vpop.eup %2181 }
 0xf6c   :  { %v922_v22 = vadd.f32 1.0, %v2182_v5 }
 0xf6e   :  { %2183 = vrcp.f32 %v922_v22 }
 0xf7b   :  { %v2184_v33 = vpop.eup %2183 }
 0xfdd   :  { %v942_v36 = vpop.permute.xlu0 %941 }
 0xfde   :  { %v944_v43 = vmul.f32 %v2184_v33, %v942_v36 }
 0xfe0   :  { %v950_v44 = vpack.c.bf16 %v944_v43, %v944_v43 }
 0xfe2   :  { %2034 = vmatmul.mubr.msk.bf16.vlgmr.msra.gmra.mxu0 %vm141_vm0, %v950_v44 }
 0xfe3   :  { %1127 = vmatpush1.bf16.msra.mxu0 %v2363_v4  ;;  %1150 = vmatprep.mubr.bf16.mxu0 %v2313_v1 }
 0xfe4   :  { %1128 = vmatprep.subr.bf16.mxu0 %v2373_v6 }
 0xfe7   :  { %1129 = vmatpush1.bf16.msra.mxu0 %v2381_v8 }
 0xfe8   :  { %1130 = vmatprep.subr.bf16.mxu0 %v2390_v10 }
 0xfeb   :  { %1131 = vmatpush1.bf16.msra.mxu0 %v2398_v12 }
 0xfec   :  { %1132 = vmatprep.subr.bf16.mxu0 %v2408_v14 }
 0xfef   :  { %1133 = vmatpush1.bf16.msra.mxu0 %v2416_v16 }
 0xff0   :  { %1290 = vmatprep.subr.bf16.mxu0 %v2355_v2 }
0x10a2   :  { %v988_v45 = vpop.f32.mrf.mxu0 }
0x10a3   :  { %v995_v47 = vadd.f32 %v988_v45, %v238_v7 }
0x10a4   :  { %v990_v0 = vpop.f32.mrf.mxu0 }
0x10a5   :  { %v996_v48 = vadd.f32 %v990_v0, %v240_v46  ;;  %v2035_v52 = vmul.f32 -1.442695, %v995_v47 }
0x10a6   :  { %v992_v49 = vpop.f32.mrf.mxu0 }
0x10a7   :  { %2185 = vtanh.f32 %v996_v48  ;;  %v2036_v59 = vmul.f32 -1.442695, %v996_v48 }
0x10a8   :  { %v993_v50 = vpop.f32.mrf.mxu0  ;;  %2187 = vpow2.f32 %v2035_v52 }
0x10b4   :  { %v2186_v51 = vpop.eup %2185 }
0x10b5   :  { %1012 = vrot.lane.b32.xlu1 %v2186_v51, %s2314_s4  ;;  %v2188_v53 = vpop.eup %2187 }
0x10b6   :  { %v1003_v2 = vadd.f32 1.0, %v2188_v53 }
0x10b8   :  { %2189 = vrcp.f32 %v1003_v2  ;;  %v2693_v2 = vld [vmem:[%s2887_s3 + $0x30] ss:$8 sps:$4 sm:$0xff]  }
0x10c5   :  { %v2190_v54 = vpop.eup %2189 }
0x10c6   :  { %v1010_v15 = vmul.f32 %v2190_v54, %v938_v62  ;;  %v2679_v62 = vld [vmem:[%s2887_s3 + $0x34] ss:$8 sps:$4 sm:$0xff]  }
0x1127   :  { %v1013_v13 = vpop.permute.xlu1 %1012 }
0x1128   :  { %v1015_v55 = vmul.f32 %v2190_v54, %v1013_v13  ;;  %v2700_v54 = vld [vmem:[%s2887_s3 + $0x24] ss:$8 sps:$4 sm:$0xff]   ;;  %v2706_v13 = vld [vmem:[%s2887_s3 + $0x20] ss:$8 sps:$4 sm:$0xff]  }
0x112a   :  { %1017 = vrot.lane.b32.xlu0 %v1015_v55, %s2314_s4  ;;  %v2712_v55 = vld [vmem:[%s2887_s3 + $0x14] ss:$8 sps:$4 sm:$0xff]  }
0x119c   :  { %v1018_v56 = vpop.permute.xlu0 %1017 }
0x119d   :  { %v1020_v57 = vadd.f32 %v1018_v56, %v1010_v15  ;;  %v2718_v15 = vld [vmem:[%s2887_s3 + $0x10] ss:$8 sps:$4 sm:$0xff]   ;;  %v2724_v56 = vld [vmem:[%s2887_s3 + $0x4] ss:$8 sps:$4 sm:$0xff]  }
0x119f   :  { %2191 = vtanh.f32 %v1020_v57 }
0x11a0   :  { %2193 = vpow2.f32 %v2036_v59 }
0x11ac   :  { %v2192_v58 = vpop.eup %2191 }
0x11ad   :  { %1023 = vrot.lane.b32.xlu1 %v2192_v58, %s2314_s4  ;;  %v2194_v9 = vpop.eup %2193  ;;  %v248_v58 = vadd.f32 %v2585_v25, %v2457_v23 }
0x11ae   :  { %v1004_v60 = vadd.f32 1.0, %v2194_v9  ;;  %v250_v9 = vadd.f32 %v2587_v26, %v2459_v24 }
0x11b0   :  { %2195 = vrcp.f32 %v1004_v60 }
0x11bd   :  { %v2196_v11 = vpop.eup %2195 }
0x121f   :  { %v1024_v61 = vpop.permute.xlu1 %1023 }
0x1220   :  { %v1026_v63 = vmul.f32 %v2196_v11, %v1024_v61 }
0x1222   :  { %v1032_v3 = vpack.c.bf16 %v1026_v63, %v1026_v63 }
0x1224   :  { %2037 = vmatmul.mubr.msk.bf16.vlgmr.msra.gmra.mxu1 %vm141_vm0, %v1032_v3 }
0x1225   :  { %1209 = vmatpush1.bf16.msra.mxu1 %v2363_v4  ;;  %1232 = vmatprep.mubr.bf16.mxu1 %v2313_v1  ;;  %v244_v4 = vadd.f32 %v2581_v17, %v2457_v23 }
0x1226   :  { %1210 = vmatprep.subr.bf16.mxu1 %v2373_v6 }
0x1229   :  { %1211 = vmatpush1.bf16.msra.mxu1 %v2381_v8  ;;  %v246_v8 = vadd.f32 %v2583_v21, %v2459_v24 }
0x122a   :  { %1212 = vmatprep.subr.bf16.mxu1 %v2390_v10 }
0x122d   :  { %1213 = vmatpush1.bf16.msra.mxu1 %v2398_v12 }
0x122e   :  { %1214 = vmatprep.subr.bf16.mxu1 %v2408_v14 }
0x1231   :  { %1215 = vmatpush1.bf16.msra.mxu1 %v2416_v16 }
0x1232   :  { %1372 = vmatprep.subr.bf16.mxu1 %v2679_v62 }
0x12e4   :  { %v1070_v6 = vpop.f32.mrf.mxu1 }
0x12e5   :  { %v1077_v10 = vadd.f32 %v1070_v6, %v244_v4 }
0x12e6   :  { %v1072_v12 = vpop.f32.mrf.mxu1 }
0x12e7   :  { %v1078_v5 = vadd.f32 %v1072_v12, %v246_v8  ;;  %v2038_v33 = vmul.f32 -1.442695, %v1077_v10 }
0x12e8   :  { %v1074_v14 = vpop.f32.mrf.mxu1 }
0x12e9   :  { %2197 = vtanh.f32 %v1078_v5  ;;  %v2039_v0 = vmul.f32 -1.442695, %v1078_v5 }
0x12ea   :  { %v1075_v16 = vpop.f32.mrf.mxu1  ;;  %2199 = vpow2.f32 %v2038_v33 }
0x12f6   :  { %v2198_v22 = vpop.eup %2197 }
0x12f7   :  { %1094 = vrot.lane.b32.xlu0 %v2198_v22, %s2314_s4  ;;  %v2200_v36 = vpop.eup %2199 }
0x12f8   :  { %v1085_v43 = vadd.f32 1.0, %v2200_v36 }
0x12fa   :  { %2201 = vrcp.f32 %v1085_v43 }
0x1307   :  { %v2202_v44 = vpop.eup %2201 }
0x1308   :  { %v1092_v21 = vmul.f32 %v2202_v44, %v1020_v57  ;;  %v2730_v57 = vld [vmem:[%s2887_s3] ss:$8 sps:$4 sm:$0xff]   ;;  %s2315_s3 = smov 96  }
0x1369   :  { %v1095_v17 = vpop.permute.xlu0 %1094 }
0x136a   :  { %v1097_v7 = vmul.f32 %v2202_v44, %v1095_v17 }
0x136c   :  { %1099 = vrot.lane.b32.xlu1 %v1097_v7, %s2314_s4 }
0x13de   :  { %v1100_v45 = vpop.permute.xlu1 %1099 }
0x13df   :  { %v1102_v46 = vadd.f32 %v1100_v45, %v1092_v21  ;;  %v254_v45 = vadd.f32 %v2589_v27, %v2457_v23 }
0x13e1   :  { %2203 = vtanh.f32 %v1102_v46 }
0x13e2   :  { %2205 = vpow2.f32 %v2039_v0 }
0x13ee   :  { %v2204_v47 = vpop.eup %2203 }
0x13ef   :  { %1105 = vrot.lane.b32.xlu0 %v2204_v47, %s2314_s4  ;;  %v2206_v48 = vpop.eup %2205  ;;  %v256_v47 = vadd.f32 %v2591_v28, %v2459_v24 }
0x13f0   :  { %v1086_v49 = vadd.f32 1.0, %v2206_v48 }
0x13f2   :  { %2207 = vrcp.f32 %v1086_v49 }
0x13ff   :  { %v2208_v50 = vpop.eup %2207 }
0x1461   :  { %v1106_v51 = vpop.permute.xlu0 %1105 }
0x1462   :  { %v1108_v52 = vmul.f32 %v2208_v50, %v1106_v51 }
0x1464   :  { %v1114_v53 = vpack.c.bf16 %v1108_v52, %v1108_v52 }
0x1466   :  { %2040 = vmatmul.mubr.msk.bf16.vlgmr.msra.gmra.mxu0 %vm141_vm0, %v1114_v53 }
0x1467   :  { %1291 = vmatpush1.bf16.msra.mxu0 %v2693_v2  ;;  %1314 = vmatprep.mubr.bf16.mxu0 %v2313_v1 }
0x1468   :  { %1292 = vmatprep.subr.bf16.mxu0 %v2700_v54 }
0x146b   :  { %1293 = vmatpush1.bf16.msra.mxu0 %v2706_v13 }
0x146c   :  { %1294 = vmatprep.subr.bf16.mxu0 %v2712_v55 }
0x146f   :  { %1295 = vmatpush1.bf16.msra.mxu0 %v2718_v15 }
0x1470   :  { %1296 = vmatprep.subr.bf16.mxu0 %v2724_v56 }
0x1473   :  { %1297 = vmatpush1.bf16.msra.mxu0 %v2730_v57 }
0x1474   :  { %1454 = vmatprep.subr.bf16.mxu0 %v2679_v62 }
0x1526   :  { %v1152_v59 = vpop.f32.mrf.mxu0 }
0x1527   :  { %v1159_v60 = vadd.f32 %v1152_v59, %v248_v58 }
0x1528   :  { %v1154_v11 = vpop.f32.mrf.mxu0 }
0x1529   :  { %v1160_v61 = vadd.f32 %v1154_v11, %v250_v9  ;;  %v2041_v6 = vmul.f32 -1.442695, %v1159_v60 }
0x152a   :  { %v1156_v63 = vpop.f32.mrf.mxu0 }
0x152b   :  { %2209 = vtanh.f32 %v1160_v61  ;;  %v2042_v33 = vmul.f32 -1.442695, %v1160_v61 }
0x152c   :  { %v1157_v3 = vpop.f32.mrf.mxu0  ;;  %2211 = vpow2.f32 %v2041_v6 }
0x1538   :  { %v2210_v4 = vpop.eup %2209 }
0x1539   :  { %1176 = vrot.lane.b32.xlu1 %v2210_v4, %s2314_s4  ;;  %v2212_v8 = vpop.eup %2211 }
0x153a   :  { %v1167_v10 = vadd.f32 1.0, %v2212_v8 }
0x153c   :  { %2213 = vrcp.f32 %v1167_v10 }
0x1549   :  { %v2214_v12 = vpop.eup %2213 }
0x154a   :  { %v1174_v26 = vmul.f32 %v2214_v12, %v1102_v46 }
0x15ab   :  { %v1177_v25 = vpop.permute.xlu1 %1176 }
0x15ac   :  { %v1179_v5 = vmul.f32 %v2214_v12, %v1177_v25 }
0x15ae   :  { %1181 = vrot.lane.b32.xlu0 %v1179_v5, %s2314_s4  ;;  %v258_v5 = vadd.f32 %v2593_v29, %v2457_v23 }
0x1620   :  { %v1182_v14 = vpop.permute.xlu0 %1181 }
0x1621   :  { %v1184_v16 = vadd.f32 %v1182_v14, %v1174_v26  ;;  %v260_v14 = vadd.f32 %v2595_v30, %v2459_v24 }
0x1623   :  { %2215 = vtanh.f32 %v1184_v16 }
0x1624   :  { %2217 = vpow2.f32 %v2042_v33 }
0x1630   :  { %v2216_v22 = vpop.eup %2215 }
0x1631   :  { %1187 = vrot.lane.b32.xlu1 %v2216_v22, %s2314_s4  ;;  %v2218_v36 = vpop.eup %2217 }
0x1632   :  { %v1168_v43 = vadd.f32 1.0, %v2218_v36 }
0x1634   :  { %2219 = vrcp.f32 %v1168_v43 }
0x1641   :  { %v2220_v44 = vpop.eup %2219 }
0x16a3   :  { %v1188_v17 = vpop.permute.xlu1 %1187 }
0x16a4   :  { %v1190_v7 = vmul.f32 %v2220_v44, %v1188_v17 }
0x16a6   :  { %v1196_v21 = vpack.c.bf16 %v1190_v7, %v1190_v7 }
0x16a8   :  { %2043 = vmatmul.mubr.msk.bf16.vlgmr.msra.gmra.mxu1 %vm141_vm0, %v1196_v21 }
0x16a9   :  { %1373 = vmatpush1.bf16.msra.mxu1 %v2693_v2  ;;  %1396 = vmatprep.mubr.bf16.mxu1 %v2313_v1 }
0x16aa   :  { %1374 = vmatprep.subr.bf16.mxu1 %v2700_v54 }
0x16ad   :  { %1375 = vmatpush1.bf16.msra.mxu1 %v2706_v13 }
0x16ae   :  { %1376 = vmatprep.subr.bf16.mxu1 %v2712_v55 }
0x16b1   :  { %1377 = vmatpush1.bf16.msra.mxu1 %v2718_v15 }
0x16b2   :  { %1378 = vmatprep.subr.bf16.mxu1 %v2724_v56 }
0x16b5   :  { %1379 = vmatpush1.bf16.msra.mxu1 %v2730_v57 }
0x16b6   :  { %1536 = vmatprep.subr.bf16.mxu1 %v2679_v62 }
0x1768   :  { %v1234_v46 = vpop.f32.mrf.mxu1 }
0x1769   :  { %v1241_v0 = vadd.f32 %v1234_v46, %v254_v45 }
0x176a   :  { %v1236_v48 = vpop.f32.mrf.mxu1 }
0x176b   :  { %v1242_v49 = vadd.f32 %v1236_v48, %v256_v47  ;;  %v2044_v53 = vmul.f32 -1.442695, %v1241_v0 }
0x176c   :  { %v1238_v50 = vpop.f32.mrf.mxu1 }
0x176d   :  { %2221 = vtanh.f32 %v1242_v49  ;;  %v2045_v3 = vmul.f32 -1.442695, %v1242_v49 }
0x176e   :  { %v1239_v51 = vpop.f32.mrf.mxu1  ;;  %2223 = vpow2.f32 %v2044_v53 }
0x177a   :  { %v2222_v52 = vpop.eup %2221 }
0x177b   :  { %1258 = vrot.lane.b32.xlu0 %v2222_v52, %s2314_s4  ;;  %v2224_v58 = vpop.eup %2223 }
0x177c   :  { %v1249_v59 = vadd.f32 1.0, %v2224_v58 }
0x177e   :  { %2225 = vrcp.f32 %v1249_v59 }
0x178b   :  { %v2226_v9 = vpop.eup %2225 }
0x178c   :  { %v1256_v28 = vmul.f32 %v2226_v9, %v1184_v16 }
0x17ed   :  { %v1259_v27 = vpop.permute.xlu0 %1258 }
0x17ee   :  { %v1261_v60 = vmul.f32 %v2226_v9, %v1259_v27  ;;  %v264_v9 = vadd.f32 %v2597_v31, %v2457_v23 }
0x17f0   :  { %1263 = vrot.lane.b32.xlu1 %v1261_v60, %s2314_s4  ;;  %v266_v60 = vadd.f32 %v2599_v32, %v2459_v24 }
0x1862   :  { %v1264_v11 = vpop.permute.xlu1 %1263 }
0x1863   :  { %v1266_v61 = vadd.f32 %v1264_v11, %v1256_v28 }
0x1865   :  { %2227 = vtanh.f32 %v1266_v61 }
0x1866   :  { %2229 = vpow2.f32 %v2045_v3 }
0x1872   :  { %v2228_v63 = vpop.eup %2227 }
0x1873   :  { %1269 = vrot.lane.b32.xlu0 %v2228_v63, %s2314_s4  ;;  %v2230_v4 = vpop.eup %2229 }
0x1874   :  { %v1250_v6 = vadd.f32 1.0, %v2230_v4 }
0x1876   :  { %2231 = vrcp.f32 %v1250_v6 }
0x1883   :  { %v2232_v8 = vpop.eup %2231 }
0x18e5   :  { %v1270_v10 = vpop.permute.xlu0 %1269 }
0x18e6   :  { %v1272_v12 = vmul.f32 %v2232_v8, %v1270_v10 }
0x18e8   :  { %v1278_v25 = vpack.c.bf16 %v1272_v12, %v1272_v12 }
0x18ea   :  { %2046 = vmatmul.mubr.msk.bf16.vlgmr.msra.gmra.mxu0 %vm141_vm0, %v1278_v25 }
0x18eb   :  { %1455 = vmatpush1.bf16.msra.mxu0 %v2693_v2  ;;  %1478 = vmatprep.mubr.bf16.mxu0 %v2313_v1 }
0x18ec   :  { %1456 = vmatprep.subr.bf16.mxu0 %v2700_v54 }
0x18ef   :  { %1457 = vmatpush1.bf16.msra.mxu0 %v2706_v13 }
0x18f0   :  { %1458 = vmatprep.subr.bf16.mxu0 %v2712_v55 }
0x18f3   :  { %1459 = vmatpush1.bf16.msra.mxu0 %v2718_v15 }
0x18f4   :  { %1460 = vmatprep.subr.bf16.mxu0 %v2724_v56 }
0x18f7   :  { %1461 = vmatpush1.bf16.msra.mxu0 %v2730_v57 }
0x18f8   :  { %1618 = vmatprep.subr.bf16.mxu0 %v2679_v62 }
0x19aa   :  { %v1316_v26 = vpop.f32.mrf.mxu0 }
0x19ab   :  { %v1323_v16 = vadd.f32 %v1316_v26, %v258_v5 }
0x19ac   :  { %v1318_v22 = vpop.f32.mrf.mxu0 }
0x19ad   :  { %v1324_v33 = vadd.f32 %v1318_v22, %v260_v14  ;;  %v2047_v17 = vmul.f32 -1.442695, %v1323_v16 }
0x19ae   :  { %v1320_v36 = vpop.f32.mrf.mxu0 }
0x19af   :  { %2233 = vtanh.f32 %v1324_v33  ;;  %v2048_v49 = vmul.f32 -1.442695, %v1324_v33 }
0x19b0   :  { %v1321_v43 = vpop.f32.mrf.mxu0  ;;  %2235 = vpow2.f32 %v2047_v17  ;;  %v268_v17 = vadd.f32 %v2601_v34, %v2457_v23 }
0x19bc   :  { %v2234_v44 = vpop.eup %2233 }
0x19bd   :  { %1340 = vrot.lane.b32.xlu1 %v2234_v44, %s2314_s4  ;;  %v2236_v7 = vpop.eup %2235 }
0x19be   :  { %v1331_v21 = vadd.f32 1.0, %v2236_v7 }
0x19c0   :  { %2237 = vrcp.f32 %v1331_v21  ;;  %v270_v21 = vadd.f32 %v2603_v35, %v2459_v24 }
0x19cd   :  { %v2238_v45 = vpop.eup %2237 }
0x19ce   :  { %v1338_v30 = vmul.f32 %v2238_v45, %v1266_v61 }
0x1a2f   :  { %v1341_v29 = vpop.permute.xlu1 %1340 }
0x1a30   :  { %v1343_v46 = vmul.f32 %v2238_v45, %v1341_v29 }
0x1a32   :  { %1345 = vrot.lane.b32.xlu0 %v1343_v46, %s2314_s4 }
0x1aa4   :  { %v1346_v47 = vpop.permute.xlu0 %1345 }
0x1aa5   :  { %v1348_v0 = vadd.f32 %v1346_v47, %v1338_v30 }
0x1aa7   :  { %2239 = vtanh.f32 %v1348_v0 }
0x1aa8   :  { %2241 = vpow2.f32 %v2048_v49 }
0x1ab4   :  { %v2240_v48 = vpop.eup %2239 }
0x1ab5   :  { %1351 = vrot.lane.b32.xlu1 %v2240_v48, %s2314_s4  ;;  %v2242_v50 = vpop.eup %2241 }
0x1ab6   :  { %v1332_v51 = vadd.f32 1.0, %v2242_v50 }
0x1ab8   :  { %2243 = vrcp.f32 %v1332_v51 }
0x1ac5   :  { %v2244_v52 = vpop.eup %2243 }
0x1b27   :  { %v1352_v53 = vpop.permute.xlu1 %1351 }
0x1b28   :  { %v1354_v58 = vmul.f32 %v2244_v52, %v1352_v53 }
0x1b2a   :  { %v1360_v59 = vpack.c.bf16 %v1354_v58, %v1354_v58 }
0x1b2c   :  { %2049 = vmatmul.mubr.msk.bf16.vlgmr.msra.gmra.mxu1 %vm141_vm0, %v1360_v59 }
0x1b2d   :  { %1537 = vmatpush1.bf16.msra.mxu1 %v2693_v2  ;;  %1560 = vmatprep.mubr.bf16.mxu1 %v2313_v1 }
0x1b2e   :  { %1538 = vmatprep.subr.bf16.mxu1 %v2700_v54 }
0x1b31   :  { %1539 = vmatpush1.bf16.msra.mxu1 %v2706_v13 }
0x1b32   :  { %1540 = vmatprep.subr.bf16.mxu1 %v2712_v55 }
0x1b35   :  { %1541 = vmatpush1.bf16.msra.mxu1 %v2718_v15 }
0x1b36   :  { %1542 = vmatprep.subr.bf16.mxu1 %v2724_v56 }
0x1b39   :  { %1543 = vmatpush1.bf16.msra.mxu1 %v2730_v57 }
0x1b3a   :  { %1700 = vmatprep.subr.bf16.mxu1 %v2679_v62 }
0x1bec   :  { %v1398_v27 = vpop.f32.mrf.mxu1 }
0x1bed   :  { %v1405_v28 = vadd.f32 %v1398_v27, %v264_v9 }
0x1bee   :  { %v1400_v11 = vpop.f32.mrf.mxu1 }
0x1bef   :  { %v1406_v61 = vadd.f32 %v1400_v11, %v266_v60  ;;  %v2050_v6 = vmul.f32 -1.442695, %v1405_v28 }
0x1bf0   :  { %v1402_v63 = vpop.f32.mrf.mxu1 }
0x1bf1   :  { %2245 = vtanh.f32 %v1406_v61  ;;  %v2051_v14 = vmul.f32 -1.442695, %v1406_v61 }
0x1bf2   :  { %v1403_v3 = vpop.f32.mrf.mxu1  ;;  %2247 = vpow2.f32 %v2050_v6 }
0x1bf3   :  { %v274_v3 = vadd.f32 %v2605_v37, %v2457_v23 }
0x1bfe   :  { %v2246_v4 = vpop.eup %2245 }
0x1bff   :  { %1422 = vrot.lane.b32.xlu0 %v2246_v4, %s2314_s4  ;;  %v2248_v8 = vpop.eup %2247 }
0x1c00   :  { %v1413_v62 = vadd.f32 1.0, %v2248_v8 }
0x1c02   :  { %2249 = vrcp.f32 %v1413_v62 }
0x1c0f   :  { %v2250_v10 = vpop.eup %2249 }
0x1c10   :  { %v1420_v32 = vmul.f32 %v2250_v10, %v1348_v0 }
0x1c71   :  { %v1423_v31 = vpop.permute.xlu0 %1422 }
0x1c72   :  { %v1425_v12 = vmul.f32 %v2250_v10, %v1423_v31 }
0x1c74   :  { %1427 = vrot.lane.b32.xlu1 %v1425_v12, %s2314_s4 }
0x1ce6   :  { %v1428_v25 = vpop.permute.xlu1 %1427 }
0x1ce7   :  { %v1430_v5 = vadd.f32 %v1428_v25, %v1420_v32 }
0x1ce9   :  { %2251 = vtanh.f32 %v1430_v5 }
0x1cea   :  { %2253 = vpow2.f32 %v2051_v14 }
0x1cf6   :  { %v2252_v26 = vpop.eup %2251 }
0x1cf7   :  { %1433 = vrot.lane.b32.xlu0 %v2252_v26, %s2314_s4  ;;  %v2254_v16 = vpop.eup %2253 }
0x1cf8   :  { %v1414_v22 = vadd.f32 1.0, %v2254_v16 }
0x1cfa   :  { %2255 = vrcp.f32 %v1414_v22 }
0x1d07   :  { %v2256_v33 = vpop.eup %2255 }
0x1d69   :  { %v1434_v36 = vpop.permute.xlu0 %1433 }
0x1d6a   :  { %v1436_v43 = vmul.f32 %v2256_v33, %v1434_v36  ;;  %v278_v36 = vadd.f32 %v2609_v39, %v2457_v23 }
0x1d6c   :  { %v1442_v44 = vpack.c.bf16 %v1436_v43, %v1436_v43 }
0x1d6e   :  { %2052 = vmatmul.mubr.msk.bf16.vlgmr.msra.gmra.mxu0 %vm141_vm0, %v1442_v44  ;;  %v280_v44 = vadd.f32 %v2611_v40, %v2459_v24 }
0x1d6f   :  { %1619 = vmatpush1.bf16.msra.mxu0 %v2693_v2  ;;  %1642 = vmatprep.mubr.bf16.mxu0 %v2313_v1 }
0x1d70   :  { %1620 = vmatprep.subr.bf16.mxu0 %v2700_v54 }
0x1d73   :  { %1621 = vmatpush1.bf16.msra.mxu0 %v2706_v13 }
0x1d74   :  { %1622 = vmatprep.subr.bf16.mxu0 %v2712_v55 }
0x1d77   :  { %1623 = vmatpush1.bf16.msra.mxu0 %v2718_v15 }
0x1d78   :  { %1624 = vmatprep.subr.bf16.mxu0 %v2724_v56 }
0x1d7b   :  { %1625 = vmatpush1.bf16.msra.mxu0 %v2730_v57 }
0x1e2e   :  { %v1480_v7 = vpop.f32.mrf.mxu0 }
0x1e2f   :  { %v1487_v45 = vadd.f32 %v1480_v7, %v268_v17 }
0x1e30   :  { %v1482_v29 = vpop.f32.mrf.mxu0 }
0x1e31   :  { %v1488_v46 = vadd.f32 %v1482_v29, %v270_v21  ;;  %v2053_v48 = vmul.f32 -1.442695, %v1487_v45 }
0x1e32   :  { %v1484_v30 = vpop.f32.mrf.mxu0 }
0x1e33   :  { %2257 = vtanh.f32 %v1488_v46  ;;  %v2054_v9 = vmul.f32 -1.442695, %v1488_v46 }
0x1e34   :  { %v1485_v47 = vpop.f32.mrf.mxu0  ;;  %2259 = vpow2.f32 %v2053_v48 }
0x1e40   :  { %v2258_v0 = vpop.eup %2257 }
0x1e41   :  { %1504 = vrot.lane.b32.xlu1 %v2258_v0, %s2314_s4  ;;  %v2260_v49 = vpop.eup %2259 }
0x1e42   :  { %v1495_v50 = vadd.f32 1.0, %v2260_v49 }
0x1e44   :  { %2261 = vrcp.f32 %v1495_v50 }
0x1e51   :  { %v2262_v51 = vpop.eup %2261 }
0x1e52   :  { %v1502_v35 = vmul.f32 %v2262_v51, %v1430_v5 }
0x1eb3   :  { %v1505_v34 = vpop.permute.xlu1 %1504 }
0x1eb4   :  { %v1507_v52 = vmul.f32 %v2262_v51, %v1505_v34 }
0x1eb6   :  { %1509 = vrot.lane.b32.xlu0 %v1507_v52, %s2314_s4 }
0x1f28   :  { %v1510_v53 = vpop.permute.xlu0 %1509 }
0x1f29   :  { %v1512_v58 = vadd.f32 %v1510_v53, %v1502_v35 }
0x1f2b   :  { %2263 = vtanh.f32 %v1512_v58 }
0x1f2c   :  { %2265 = vpow2.f32 %v2054_v9 }
0x1f38   :  { %v2264_v59 = vpop.eup %2263 }
0x1f39   :  { %1515 = vrot.lane.b32.xlu1 %v2264_v59, %s2314_s4  ;;  %v2266_v27 = vpop.eup %2265 }
0x1f3a   :  { %v1496_v60 = vadd.f32 1.0, %v2266_v27 }
0x1f3c   :  { %2267 = vrcp.f32 %v1496_v60  ;;  %v284_v60 = vadd.f32 %v2613_v41, %v2457_v23 }
0x1f49   :  { %v2268_v28 = vpop.eup %2267 }
0x1fab   :  { %v1516_v11 = vpop.permute.xlu1 %1515 }
0x1fac   :  { %v1518_v61 = vmul.f32 %v2268_v28, %v1516_v11  ;;  %v286_v11 = vadd.f32 %v2615_v42, %v2459_v24 }
0x1fae   :  { %v1524_v63 = vpack.c.bf16 %v1518_v61, %v1518_v61 }
0x1fb0   :  { %2055 = vmatmul.mubr.msk.bf16.vlgmr.msra.gmra.mxu1 %vm141_vm0, %v1524_v63 }
0x1fb1   :  { %1701 = vmatpush1.bf16.msra.mxu1 %v2693_v2  ;;  %1724 = vmatprep.mubr.bf16.mxu1 %v2313_v1  ;;  %v276_v2 = vadd.f32 %v2607_v38, %v2459_v24 }
0x1fb2   :  { %1702 = vmatprep.subr.bf16.mxu1 %v2700_v54 }
0x1fb5   :  { %1703 = vmatpush1.bf16.msra.mxu1 %v2706_v13 }
0x1fb6   :  { %1704 = vmatprep.subr.bf16.mxu1 %v2712_v55 }
0x1fb9   :  { %1705 = vmatpush1.bf16.msra.mxu1 %v2718_v15 }
0x1fba   :  { %1706 = vmatprep.subr.bf16.mxu1 %v2724_v56 }
0x1fbd   :  { %1707 = vmatpush1.bf16.msra.mxu1 %v2730_v57 }
0x2070   :  { %v1562_v4 = vpop.f32.mrf.mxu1 }
0x2071   :  { %v1569_v1 = vadd.f32 %v1562_v4, %v274_v3 }
0x2072   :  { %v1564_v6 = vpop.f32.mrf.mxu1 }
0x2073   :  { %v1570_v54 = vadd.f32 %v1564_v6, %v276_v2  ;;  %v2056_v15 = vmul.f32 -1.442695, %v1569_v1 }
0x2074   :  { %v1566_v8 = vpop.f32.mrf.mxu1 }
0x2075   :  { %2269 = vtanh.f32 %v1570_v54  ;;  %v2057_v25 = vmul.f32 -1.442695, %v1570_v54 }
0x2076   :  { %v1567_v13 = vpop.f32.mrf.mxu1  ;;  %2271 = vpow2.f32 %v2056_v15 }
0x2082   :  { %v2270_v55 = vpop.eup %2269 }
0x2083   :  { %1586 = vrot.lane.b32.xlu0 %v2270_v55, %s2314_s4  ;;  %v2272_v56 = vpop.eup %2271 }
0x2084   :  { %v1577_v57 = vadd.f32 1.0, %v2272_v56 }
0x2086   :  { %2273 = vrcp.f32 %v1577_v57 }
0x2093   :  { %v2274_v62 = vpop.eup %2273 }
0x2094   :  { %v1584_v38 = vmul.f32 %v2274_v62, %v1512_v58 }
0x20f5   :  { %v1587_v37 = vpop.permute.xlu0 %1586 }
0x20f6   :  { %v1589_v10 = vmul.f32 %v2274_v62, %v1587_v37 }
0x20f8   :  { %1591 = vrot.lane.b32.xlu1 %v1589_v10, %s2314_s4 }
0x216a   :  { %v1592_v31 = vpop.permute.xlu1 %1591 }
0x216b   :  { %v1594_v12 = vadd.f32 %v1592_v31, %v1584_v38  ;;  %v2316_v31 = vmov 1966171168  }
0x216d   :  { %2275 = vtanh.f32 %v1594_v12 }
0x216e   :  { %2277 = vpow2.f32 %v2057_v25 }
0x217a   :  { %v2276_v32 = vpop.eup %2275 }
0x217b   :  { %1597 = vrot.lane.b32.xlu0 %v2276_v32, %s2314_s4  ;;  %v2278_v5 = vpop.eup %2277 }
0x217c   :  { %v1578_v26 = vadd.f32 1.0, %v2278_v5 }
0x217e   :  { %2279 = vrcp.f32 %v1578_v26 }
0x218b   :  { %v2280_v14 = vpop.eup %2279 }
0x21ed   :  { %v1598_v16 = vpop.permute.xlu0 %1597 }
0x21ee   :  { %v1600_v22 = vmul.f32 %v2280_v14, %v1598_v16 }
0x21f0   :  { %v1606_v33 = vpack.c.bf16 %v1600_v22, %v1600_v22 }
0x21f2   :  { %2058 = vmatmul.mubr.msk.bf16.vlgmr.msra.gmra.mxu0 %vm141_vm0, %v1606_v33 }
0x22b2   :  { %v1644_v43 = vpop.f32.mrf.mxu0 }
0x22b3   :  { %v1651_v17 = vadd.f32 %v1644_v43, %v278_v36  ;;  %v1770_v43 = vld [vmem:[%s2890_s1] sm:$0xff] }
0x22b4   :  { %v1646_v7 = vpop.f32.mrf.mxu0 }
0x22b5   :  { %v1652_v21 = vadd.f32 %v1646_v7, %v280_v44  ;;  %v2059_v30 = vmul.f32 -1.442695, %v1651_v17 }
0x22b6   :  { %v1648_v45 = vpop.f32.mrf.mxu0 }
0x22b7   :  { %2281 = vtanh.f32 %v1652_v21  ;;  %v2060_v52 = vmul.f32 -1.442695, %v1652_v21  ;;  %v1771_v45 = vld [vmem:[%s2890_s1 + $0x8] sm:$0xff] }
0x22b8   :  { %v1649_v29 = vpop.f32.mrf.mxu0  ;;  %2283 = vpow2.f32 %v2059_v30 }
0x22b9   :  { %v1772_v29 = vld [vmem:[%s2890_s1 + $0x10] sm:$0xff] }
0x22c4   :  { %v2282_v46 = vpop.eup %2281 }
0x22c5   :  { %1668 = vrot.lane.b32.xlu1 %v2282_v46, %s2314_s4  ;;  %v2284_v47 = vpop.eup %2283 }
0x22c6   :  { %v1659_v0 = vadd.f32 1.0, %v2284_v47 }
0x22c8   :  { %2285 = vrcp.f32 %v1659_v0 }
0x22d5   :  { %v2286_v48 = vpop.eup %2285 }
0x22d6   :  { %v1666_v40 = vmul.f32 %v2286_v48, %v1594_v12  ;;  %v1781_v12 = vunpack.c.l.s4 %v2316_v31 }
0x22d8   :  { %v1782_v32 = vunpack.c.0.s8 %v1781_v12 }
0x22da   :  { %v1785_v25 = vsub.s32 %v1782_v32, %v2447_v19 }
0x2337   :  { %v1669_v39 = vpop.permute.xlu1 %1668 }
0x2338   :  { %v1671_v49 = vmul.f32 %v2286_v48, %v1669_v39  ;;  %v1774_v39 = vld [vmem:[%s2890_s1 + $0x20] sm:$0xff] }
0x233a   :  { %1673 = vrot.lane.b32.xlu0 %v1671_v49, %s2314_s4 }
0x23ac   :  { %v1674_v50 = vpop.permute.xlu0 %1673 }
0x23ad   :  { %v1676_v51 = vadd.f32 %v1674_v50, %v1666_v40 }
0x23af   :  { %2287 = vtanh.f32 %v1676_v51 }
0x23b0   :  { %2289 = vpow2.f32 %v2060_v52 }
0x23bc   :  { %v2288_v34 = vpop.eup %2287 }
0x23bd   :  { %1679 = vrot.lane.b32.xlu1 %v2288_v34, %s2314_s4  ;;  %v2290_v35 = vpop.eup %2289 }
0x23be   :  { %v1660_v53 = vadd.f32 1.0, %v2290_v35 }
0x23c0   :  { %2291 = vrcp.f32 %v1660_v53  ;;  %v1773_v53 = vld [vmem:[%s2890_s1 + $0x18] sm:$0xff] }
0x23cd   :  { %v2292_v58 = vpop.eup %2291 }
0x242f   :  { %v1680_v59 = vpop.permute.xlu1 %1679 }
0x2430   :  { %v1682_v9 = vmul.f32 %v2292_v58, %v1680_v59 }
0x2432   :  { %v1688_v27 = vpack.c.bf16 %v1682_v9, %v1682_v9 }
0x2434   :  { %2061 = vmatmul.mubr.msk.bf16.vlgmr.msra.gmra.mxu1 %vm141_vm0, %v1688_v27  ;;  %v1776_v27 = vld [vmem:[%s2890_s1 + $0x30] sm:$0xff] }
0x24f4   :  { %v1726_v28 = vpop.f32.mrf.mxu1 }
0x24f5   :  { %v1733_v61 = vadd.f32 %v1726_v28, %v284_v60 }
0x24f6   :  { %v1728_v63 = vpop.f32.mrf.mxu1 }
0x24f7   :  { %v1734_v3 = vadd.f32 %v1728_v63, %v286_v11  ;;  %v2062_v6 = vmul.f32 -1.442695, %v1733_v61  ;;  %v1775_v63 = vld [vmem:[%s2890_s1 + $0x28] sm:$0xff] }
0x24f8   :  { %v1730_v4 = vpop.f32.mrf.mxu1 }
0x24f9   :  { %2293 = vtanh.f32 %v1734_v3  ;;  %v2063_v56 = vmul.f32 -1.442695, %v1734_v3 }
0x24fa   :  { %v1731_v2 = vpop.f32.mrf.mxu1  ;;  %2295 = vpow2.f32 %v2062_v6 }
0x2506   :  { %v2294_v1 = vpop.eup %2293 }
0x2507   :  { %1750 = vrot.lane.b32.xlu0 %v2294_v1, %s2314_s4  ;;  %v2296_v54 = vpop.eup %2295 }
0x2508   :  { %v1741_v8 = vadd.f32 1.0, %v2296_v54  ;;  %v1777_v54 = vld [vmem:[%s2890_s1 + $0x38] sm:$0xff] }
0x250a   :  { %2297 = vrcp.f32 %v1741_v8 }
0x2517   :  { %v2298_v13 = vpop.eup %2297 }
0x2518   :  { %v1748_v24 = vmul.f32 %v2298_v13, %v1676_v51 }
0x2579   :  { %v1751_v23 = vpop.permute.xlu0 %1750 }
0x257a   :  { %v1753_v41 = vmul.f32 %v2298_v13, %v1751_v23 }
0x257c   :  { %1755 = vrot.lane.b32.xlu1 %v1753_v41, %s2314_s4 }
0x25ee   :  { %v1756_v42 = vpop.permute.xlu1 %1755 }
0x25ef   :  { %v1758_v55 = vadd.f32 %v1756_v42, %v1748_v24  ;;  %v1910_v24 = vand.u32 127, %v48_v18 }
0x25f1   :  { %2299 = vtanh.f32 %v1758_v55 }
0x25f2   :  { %2301 = vpow2.f32 %v2063_v56 }
0x25fe   :  { %v2300_v15 = vpop.eup %2299 }
0x25ff   :  { %1761 = vrot.lane.b32.xlu0 %v2300_v15, %s2314_s4  ;;  %v2302_v57 = vpop.eup %2301 }
0x2600   :  { %v1742_v62 = vadd.f32 1.0, %v2302_v57 }
0x2602   :  { %2303 = vrcp.f32 %v1742_v62 }
0x260f   :  { %v2304_v37 = vpop.eup %2303 }
0x2671   :  { %v1762_v10 = vpop.permute.xlu0 %1761 }
0x2672   :  { %v1764_v38 = vmul.f32 %v2304_v37, %v1762_v10 }
0x2674   :  { %1766 = vrot.lane.b32.xlu1 %v1764_v38, %s2315_s3 }
0x26e6   :  { %v1767_v5 = vpop.permute.xlu1 %1766 }
0x26e7   :  { %v1769_v26 = vadd.f32 %v1767_v5, %v1764_v38 }
0x26e9   :  { %v1779_v14 = vcombine.high %v1769_v26, %v1769_v26  ;;  %v1786_v16 = vrot.slane %v1769_v26, %v1785_v25 }
0x26eb   :  { %v1793_v22 = vrot.slane %v1779_v14, %v1785_v25  ;;  %v1794_v33 = vcombine.high %v1786_v16, %v1786_v16  ;;  %v1802_v36 = vrot.slane %v1786_v16, %v1785_v25 }
0x26ed   :  { %v1795_v44 = vcombine.high %v1793_v22, %v1793_v22  ;;  %v1831_v17 = vrot.slane %v1802_v36, %v2450_v20  ;;  %v1816_v7 = vrot.slane %v1794_v33, %v1785_v25  ;;  %v1824_v21 = vcombine.high %v1802_v36, %v1802_v36 }
0x26ee   :  { %v1809_v46 = vrot.slane %v1793_v22, %v1785_v25 }
0x26ef   :  { %v1868_v30 = vmul.f32 %v1831_v17, %v1770_v43  ;;  %v1835_v47 = vrot.slane %v1816_v7, %v2450_v20  ;;  %v1839_v0 = vrot.slane %v1824_v21, %v2450_v20  ;;  %v1826_v48 = vcombine.high %v1816_v7, %v1816_v7 }
0x26f0   :  { %v1847_v49 = vrot.slane %v1809_v46, %v2450_v20  ;;  %v1825_v40 = vcombine.high %v1809_v46, %v1809_v46  ;;  %v1823_v50 = vrot.slane %v1795_v44, %v1785_v25 }
0x26f1   :  { %v1877_v51 = vsel %vm1876_vm1, %v1868_v30, 0.0  ;;  %v1869_v34 = vmul.f32 %v1835_v47, %v1771_v45  ;;  %v1870_v52 = vmul.f32 %v1839_v0, %v1772_v29  ;;  %v1843_v35 = vrot.slane %v1826_v48, %v2450_v20 }
0x26f2   :  { %1878 = vadd.xlane.f32.xlu0 %v1877_v51  ;;  %v1872_v59 = vmul.f32 %v1847_v49, %v1774_v39  ;;  %v1855_v9 = vrot.slane %v1825_v40, %v2450_v20  ;;  %v1851_v11 = vrot.slane %v1823_v50, %v2450_v20  ;;  %v1827_v61 = vcombine.high %v1823_v50, %v1823_v50 }
0x26f3   :  { %v1880_v58 = vsel %vm1876_vm1, %v1869_v34, 0.0  ;;  %v1883_v60 = vsel %vm1876_vm1, %v1870_v52, 0.0  ;;  %v1871_v28 = vmul.f32 %v1843_v35, %v1773_v53 }
0x26f4   :  { %1881 = vadd.xlane.f32.xlu1 %v1880_v58  ;;  %v1889_v3 = vsel %vm1876_vm1, %v1872_v59, 0.0  ;;  %v1874_v4 = vmul.f32 %v1855_v9, %v1776_v27  ;;  %v1873_v1 = vmul.f32 %v1851_v11, %v1775_v63  ;;  %v1859_v6 = vrot.slane %v1827_v61, %v2450_v20 }
0x26f5   :  { %v1886_v2 = vsel %vm1876_vm1, %v1871_v28, 0.0  ;;  %v1913_v20 = vsub.s32 %v1910_v24, %v2447_v19 }
0x26f6   :  { %1884 = vadd.xlane.f32.xlu0 %v1883_v60  ;;  %v1895_v8 = vsel %vm1876_vm1, %v1874_v4, 0.0  ;;  %v1892_v13 = vsel %vm1876_vm1, %v1873_v1, 0.0  ;;  %v1875_v23 = vmul.f32 %v1859_v6, %v1777_v54 }
0x26f8   :  { %1890 = vadd.xlane.f32.xlu1 %v1889_v3  ;;  %v1898_v41 = vsel %vm1876_vm1, %v1875_v23, 0.0 }
0x26fa   :  { %1887 = vadd.xlane.f32.xlu0 %v1886_v2 }
0x26fc   :  { %1896 = vadd.xlane.f32.xlu1 %v1895_v8 }
0x26fe   :  { %1893 = vadd.xlane.f32.xlu0 %v1892_v13 }
0x2702   :  { %1899 = vadd.xlane.f32.xlu0 %v1898_v41 }
0x277b   :  { %v1879_v42 = vpop.xlane.xlu0 %1878 }
0x277c   :  { %v1914_v57 = vrot.slane %v1879_v42, %v1913_v20 }
0x277d   :  { %v1882_v55 = vpop.xlane.xlu1 %1881 }
0x277e   :  { %v1918_v15 = vrot.slane %v1882_v55, %v1913_v20 }
0x277f   :  { %v1885_v56 = vpop.xlane.xlu0 %1884 }
0x2780   :  { %v1922_v62 = vrot.slane %v1885_v56, %v1913_v20  ;;  %v1944_v37 = vsel %vm1943_vm2, %v1918_v15, %v1914_v57 }
0x2781   :  { %v1891_v10 = vpop.xlane.xlu1 %1890 }
0x2782   :  { %v1946_v12 = vsel %vm1945_vm3, %v1922_v62, %v1944_v37  ;;  %v1930_v25 = vrot.slane %v1891_v10, %v1913_v20 }
0x2783   :  { %v1888_v38 = vpop.xlane.xlu0 %1887 }
0x2784   :  { %v1926_v31 = vrot.slane %v1888_v38, %v1913_v20 }
0x2785   :  { %v1897_v5 = vpop.xlane.xlu1 %1896 }
0x2786   :  { %v1948_v32 = vsel %vm1947_vm4, %v1926_v31, %v1946_v12  ;;  %v1938_v16 = vrot.slane %v1897_v5, %v1913_v20 }
0x2787   :  { %v1894_v18 = vpop.xlane.xlu0 %1893  ;;  %v1950_v26 = vsel %vm1949_vm5, %v1930_v25, %v1948_v32 }
0x2788   :  { %v1934_v19 = vrot.slane %v1894_v18, %v1913_v20 }
0x278a   :  { %v1952_v14 = vsel %vm1951_vm6, %v1934_v19, %v1950_v26 }
0x278b   :  { %v1900_v22 = vpop.xlane.xlu0 %1899  ;;  %v1954_v36 = vsel %vm1953_vm7, %v1938_v16, %v1952_v14 }
0x278c   :  { %v1942_v33 = vrot.slane %v1900_v22, %v1913_v20 }
0x278e   :  { %v1956_v43 = vsel %vm1955_vm8, %v1942_v33, %v1954_v36 }
0x278f   :  { %1959 = vst.msk [vmem:[%s2891_s5] sm:$0xff] %vm1958_vm9, %v1956_v43 }

</bundles_post_ra>
